<compile_context>
chip_gen: v6e
topology: v6e:2x2x1
jax: 0.10.0
libtpu: 0.0.40
codegen_flags: <defaults>
</compile_context>

<pallas_src>
import functools
import math

import jax
import jax.numpy as jnp
from jax.experimental import pallas as pl
from jax.experimental.pallas import tpu as pltpu


def additive_attention_kernel(
    x_ref,             # (BB*S, D)  f32 -- BB batches of S rows, flattened
    wq_ref, bq_ref,    # (D, D) bf16, (1, D) f32
    wv_ref, bv_ref,    # (D, D) bf16, (1, D) f32
    wk_ref, bk_ref,    # (D, D) bf16, (1, D) f32
    wWq_ref, bWq_ref,  # (D, H) bf16, (1, H) f32   (1/sqrt(head_dim) pre-folded)
    wWk_ref, bWk_ref,  # (D, H) bf16, (1, H) f32   (1/sqrt(head_dim) pre-folded)
    wr_ref, br_ref,    # (D, D) bf16, (1, D) f32
    e_ref,             # (H, D) f32 head mask: E[h, h*dd:(h+1)*dd] = 1
    o_ref,             # (BB*S, D)  f32
    *,
    seq_len: int,
    batch_block: int,
):
    bb, s = batch_block, seq_len
    d = x_ref.shape[-1]
    f32, bf16 = jnp.float32, jnp.bfloat16

    # In-kernel cast (no separate HBM cast pass in the wrapper).
    x2 = x_ref[...].astype(bf16)                              # (BB*S, D) bf16

    # Wide bf16 MXU matmuls over all BB*S rows at once, f32 accumulation,
    # then carried as bf16 (halves the live VMEM slab footprint).
    q2 = (jnp.dot(x2, wq_ref[...], preferred_element_type=f32)
          + bq_ref[...]).astype(bf16)
    v2 = (jnp.dot(x2, wv_ref[...], preferred_element_type=f32)
          + bv_ref[...]).astype(bf16)
    k2 = (jnp.dot(x2, wk_ref[...], preferred_element_type=f32)
          + bk_ref[...]).astype(bf16)

    e = e_ref[...]                                            # (H, D) f32

    # ---- alphas = softmax over sequence of W_q(q)/sqrt(head_dim) (scale folded)
    sq2 = jnp.dot(q2, wWq_ref[...], preferred_element_type=f32) + bWq_ref[...]
    sq3 = sq2.reshape(bb, s, -1)                              # (BB, S, H) f32
    sq3 = sq3 - jnp.max(sq3, axis=1, keepdims=True)
    eq = jnp.exp(sq3)
    inv_lq = pl.reciprocal(jnp.sum(eq, axis=1, keepdims=True), approx=True)
    alphas = eq * inv_lq                                      # (BB, S, H) f32

    # ---- global query: contract over S on the MXU, then tiny (H, D) mask+sum.
    q3 = q2.reshape(bb, s, d)
    gq3 = jnp.einsum('bsh,bsd->bhd', alphas.astype(bf16), q3,
                     preferred_element_type=f32)              # (BB, H, D)
    # TODO(synk): for large H replace mask-sum with per-head slicing to avoid
    # the H-times-redundant multiply+reduce (noise at H=4).
    gq = jnp.sum(gq3 * e[None, :, :], axis=1)                 # (BB, D) f32

    # p = k * global_query  -- f32 elementwise (v5e-friendly), carried as bf16.
    p3 = (k2.reshape(bb, s, d).astype(f32) * gq[:, None, :]).astype(bf16)
    p2 = p3.reshape(bb * s, d)

    # ---- betas = softmax over sequence of W_k(p)/sqrt(head_dim) ----
    sk2 = jnp.dot(p2, wWk_ref[...], preferred_element_type=f32) + bWk_ref[...]
    sk3 = sk2.reshape(bb, s, -1)
    sk3 = sk3 - jnp.max(sk3, axis=1, keepdims=True)
    ek = jnp.exp(sk3)
    inv_lk = pl.reciprocal(jnp.sum(ek, axis=1, keepdims=True), approx=True)
    betas = ek * inv_lk                                       # (BB, S, H) f32

    gk3 = jnp.einsum('bsh,bsd->bhd', betas.astype(bf16), p3,
                     preferred_element_type=f32)
    gk = jnp.sum(gk3 * e[None, :, :], axis=1)                 # (BB, D) f32

    # ---- u = v * global_key ; out = q + r_out(u)  (dropout = identity, eval) --
    u2 = (v2.reshape(bb, s, d).astype(f32) * gk[:, None, :]
          ).astype(bf16).reshape(bb * s, d)
    out2 = (q2.astype(f32)
            + jnp.dot(u2, wr_ref[...], preferred_element_type=f32)
            + br_ref[...])

    o_ref[...] = out2.astype(o_ref.dtype)


def prepare_kernel_params(params, n_heads):
    """One-time conversion of module parameters for the kernel:
       - (D, D) and (D, H) matmul weights -> bf16 (MXU fast path, half the bytes)
       - 1/sqrt(head_dim) folded into W_q / W_k weights and biases
       - biases kept in f32."""
    (wq, bq, wv, bv, wk, bk, wWq, bWq, wWk, bWk, wr, br) = params
    D = wq.shape[0]
    scale = 1.0 / math.sqrt(D // n_heads)
    bf16, f32 = jnp.bfloat16, jnp.float32
    return (
        wq.astype(bf16), bq.astype(f32),
        wv.astype(bf16), bv.astype(f32),
        wk.astype(bf16), bk.astype(f32),
        (wWq * scale).astype(bf16), (bWq * scale).astype(f32),
        (wWk * scale).astype(bf16), (bWk * scale).astype(f32),
        wr.astype(bf16), br.astype(f32),
    )


def _tpu_vmem_capacity_bytes():
    """Trace-time VMEM capacity query with a safe 128 MiB (v5e/v6e) fallback."""
    try:
        info = pltpu.get_tpu_info()
        cap = getattr(info, "vmem_capacity_bytes", None)
        if cap:
            return int(cap)
    except Exception:
        pass
    return 128 * 1024 * 1024


def _derive_batch_block_cap(S, D, vmem_bytes):
    """Max batches per grid step so the per-step working set fits VMEM.
    Bytes per (S, D) batch slab:
      x slab f32 double-buffered (8) + out slab f32 double-buffered (8)
      + ~5 live bf16 intermediates (10) + one transient f32 temp (4) = ~30."""
    per_batch = S * D * 30
    budget = int(vmem_bytes * 0.55)   # headroom for weights + compiler scratch
    return max(1, budget // max(per_batch, 1))


def _choose_batch_block(B, bb_cap, *, min_grid=4):
    """Largest divisor of B that is <= bb_cap, while keeping the grid long
    enough (>= min(min_grid, B)) to pipeline slab DMAs / feed both v7x TCs."""
    divisors = [d for d in range(1, B + 1) if B % d == 0]
    cands = [d for d in divisors if d <= max(1, bb_cap)]
    bb = max(cands)
    target = min(min_grid, B)
    while B // bb < target:
        smaller = [d for d in cands if d < bb]
        if not smaller:
            break
        bb = max(smaller)
    # TODO(synk): for prime B this degrades to bb=1; pad B upstream instead.
    return bb


def additive_attention(x, kernel_params, n_heads, *, batch_block=None):
    """x: (B, S, D) float32. kernel_params: output of prepare_kernel_params."""
    B, S, D = x.shape
    H = n_heads
    assert D % H == 0, "'input_dim' must be divisible by 'n_heads'"
    head_dim = D // H

    vmem_cap = _tpu_vmem_capacity_bytes()
    if batch_block is None:
        batch_block = _derive_batch_block_cap(S, D, vmem_cap)
    bb = _choose_batch_block(B, batch_block)
    rows = bb * S

    # Leave compiler-scratch headroom: ~51 MiB on v7x (64 MiB), ~102 MiB on
    # v5e/v6e (128 MiB).
    vmem_limit = max(32 << 20, min(int(vmem_cap * 0.8), vmem_cap - (8 << 20)))

    (wq, bq, wv, bv, wk, bk, wWq, bWq, wWk, bWk, wr, br) = kernel_params

    # Head-expansion mask for per-head pooling ('b h d_head -> b (h d_head)').
    e_mat = jnp.repeat(jnp.eye(H, dtype=jnp.float32), head_dim, axis=1)  # (H, D)

    # Flatten (B, S, D) -> (B*S, D); NO dtype cast here (cast happens in-kernel).
    x2d = x.reshape(B * S, D)

    kernel = functools.partial(additive_attention_kernel,
                               seq_len=S, batch_block=bb)

    weight_bytes = (4 * D * D + 2 * D * H) * 2 + (4 * D + 2 * H + H * D) * 4
    cost = pl.CostEstimate(
        flops=int(2 * B * S * D * (4 * D + 2 * H) + 4 * B * S * H * D),
        transcendentals=int(2 * B * S * H),
        bytes_accessed=int(2 * B * S * D * 4 + weight_bytes),
    )

    def build_and_run(single_buffer_consts):
        def const(shape):
            zeros = (0,) * len(shape)
            kwargs = {}
            if single_buffer_consts:
                # Constant index_map -> one buffer is enough; halves weight VMEM.
                kwargs["pipeline_mode"] = pl.Buffered(1)
            return pl.BlockSpec(shape, lambda i, _z=zeros: _z, **kwargs)

        grid_spec = pltpu.PrefetchScalarGridSpec(
            num_scalar_prefetch=0,
            grid=(B // bb,),
            in_specs=[
                pl.BlockSpec((rows, D), lambda i: (i, 0)),   # x slab (f32)
                const((D, D)), const((1, D)),                # q_proj
                const((D, D)), const((1, D)),                # v_proj
                const((D, D)), const((1, D)),                # k_proj
                const((D, H)), const((1, H)),                # W_q (scale folded)
                const((D, H)), const((1, H)),                # W_k (scale folded)
                const((D, D)), const((1, D)),                # r_out
                const((H, D)),                               # head mask E
            ],
            out_specs=pl.BlockSpec((rows, D), lambda i: (i, 0)),
        )
        # TODO(synk): emit bf16 output (out_shape dtype) when downstream allows
        # it to halve write-back HBM traffic and the output double-buffer.
        return pl.pallas_call(
            kernel,
            out_shape=jax.ShapeDtypeStruct((B * S, D), x.dtype),
            grid_spec=grid_spec,
            compiler_params=pltpu.CompilerParams(
                dimension_semantics=("parallel",),   # shard batch blocks across TCs
                vmem_limit_bytes=vmem_limit,
            ),
            cost_estimate=cost,
        )(x2d, wq, bq, wv, bv, wk, bk, wWq, bWq, wWk, bWk, wr, br, e_mat)

    try:
        out2d = build_and_run(True)
    except Exception:
        # Fallback if this jax build rejects pl.Buffered(1) on constant blocks.
        out2d = build_and_run(False)

    return out2d.reshape(B, S, D)


def reference_additive_attention(x, params, n_heads):
    """Pure-JAX f32 reference matching the PyTorch forward (eval mode)."""
    (wq, bq, wv, bv, wk, bk, wWq, bWq, wWk, bWk, wr, br) = params
    B, S, D = x.shape
    H = n_heads
    dd = D // H
    scale = 1.0 / math.sqrt(dd)

    q = x @ wq + bq
    v = x @ wv + bv
    k = x @ wk + bk
    alphas = jax.nn.softmax((q @ wWq + bWq) * scale, axis=1)          # (B,S,H)
    q_r = q.reshape(B, S, H, dd)
    gq = jnp.einsum('bsh,bshd->bhd', alphas, q_r).reshape(B, 1, D)
    p = k * gq
    betas = jax.nn.softmax((p @ wWk + bWk) * scale, axis=1)           # (B,S,H)
    p_r = p.reshape(B, S, H, dd)
    gk = jnp.einsum('bsh,bshd->bhd', betas, p_r).reshape(B, 1, D)
    u = v * gk
    return q + (u @ wr + br)


def make_params(key, input_dim, n_heads):
    """Deterministic synthetic weights (uniform, PyTorch-Linear-like ranges).
    Weights stored as (in, out); biases as (1, out)."""
    D, H = input_dim, n_heads
    keys = jax.random.split(key, 12)

    def lin(kw, kb, fan_in, fan_out):
        bound = 1.0 / math.sqrt(fan_in)
        w = jax.random.uniform(kw, (fan_in, fan_out), jnp.float32, -bound, bound)
        b = jax.random.uniform(kb, (1, fan_out), jnp.float32, -bound, bound)
        return w, b

    wq, bq = lin(keys[0], keys[1], D, D)
    wv, bv = lin(keys[2], keys[3], D, D)
    wk, bk = lin(keys[4], keys[5], D, D)
    wWq, bWq = lin(keys[6], keys[7], D, H)
    wWk, bWk = lin(keys[8], keys[9], D, H)
    wr, br = lin(keys[10], keys[11], D, D)
    return (wq, bq, wv, bv, wk, bk, wWq, bWq, wWk, bWk, wr, br)


if __name__ == "__main__":
    B, S, D, H = 2, 8, 32, 4

    key = jax.random.PRNGKey(0)
    kx, kp = jax.random.split(key)
    x = jax.random.normal(kx, (B, S, D), jnp.float32)
    params = make_params(kp, D, H)

    kparams = prepare_kernel_params(params, n_heads=H)   # one-time conversion
    out = additive_attention(x, kparams, n_heads=H)
    out = jax.block_until_ready(out)

    ref = reference_additive_attention(x, params, n_heads=H)
    assert out.shape == (B, S, D)
    # bf16 matmul inputs / bf16-carried intermediates -> relaxed tolerance.
    assert jnp.allclose(out, ref, atol=5e-2, rtol=5e-2), "mismatch vs reference"

    print("KERNEL_OK")
</pallas_src>

<mosaic_0001>
module attributes {stable_mosaic.version = 11 : i64} {
  func.func @additive_attention_kernel(%arg0: i32, %arg1: memref<8x32xf32, #tpu.memory_space<vmem>>, %arg2: memref<32x32xbf16, #tpu.memory_space<vmem>>, %arg3: memref<1x32xf32, #tpu.memory_space<vmem>>, %arg4: memref<32x32xbf16, #tpu.memory_space<vmem>>, %arg5: memref<1x32xf32, #tpu.memory_space<vmem>>, %arg6: memref<32x32xbf16, #tpu.memory_space<vmem>>, %arg7: memref<1x32xf32, #tpu.memory_space<vmem>>, %arg8: memref<32x4xbf16, #tpu.memory_space<vmem>>, %arg9: memref<1x4xf32, #tpu.memory_space<vmem>>, %arg10: memref<32x4xbf16, #tpu.memory_space<vmem>>, %arg11: memref<1x4xf32, #tpu.memory_space<vmem>>, %arg12: memref<32x32xbf16, #tpu.memory_space<vmem>>, %arg13: memref<1x32xf32, #tpu.memory_space<vmem>>, %arg14: memref<4x32xf32, #tpu.memory_space<vmem>>, %arg15: memref<8x32xf32, #tpu.memory_space<vmem>>) attributes {dimension_semantics = [#tpu.dimension_semantics<parallel>], iteration_bounds = array<i64: 2>, scalar_prefetch = 0 : i64, scratch_operands = 0 : i64, tpu.core_type = #tpu.core_type<tc>, window_params = [{transform_indices = @transform_0, window_bounds = array<i64: 8, 32>}, {pipeline_mode = #tpu.pipeline_mode<synchronous>, transform_indices = @transform_1, window_bounds = array<i64: 32, 32>}, {pipeline_mode = #tpu.pipeline_mode<synchronous>, transform_indices = @transform_2, window_bounds = array<i64: 1, 32>}, {pipeline_mode = #tpu.pipeline_mode<synchronous>, transform_indices = @transform_3, window_bounds = array<i64: 32, 32>}, {pipeline_mode = #tpu.pipeline_mode<synchronous>, transform_indices = @transform_4, window_bounds = array<i64: 1, 32>}, {pipeline_mode = #tpu.pipeline_mode<synchronous>, transform_indices = @transform_5, window_bounds = array<i64: 32, 32>}, {pipeline_mode = #tpu.pipeline_mode<synchronous>, transform_indices = @transform_6, window_bounds = array<i64: 1, 32>}, {pipeline_mode = #tpu.pipeline_mode<synchronous>, transform_indices = @transform_7, window_bounds = array<i64: 32, 4>}, {pipeline_mode = #tpu.pipeline_mode<synchronous>, transform_indices = @transform_8, window_bounds = array<i64: 1, 4>}, {pipeline_mode = #tpu.pipeline_mode<synchronous>, transform_indices = @transform_9, window_bounds = array<i64: 32, 4>}, {pipeline_mode = #tpu.pipeline_mode<synchronous>, transform_indices = @transform_10, window_bounds = array<i64: 1, 4>}, {pipeline_mode = #tpu.pipeline_mode<synchronous>, transform_indices = @transform_11, window_bounds = array<i64: 32, 32>}, {pipeline_mode = #tpu.pipeline_mode<synchronous>, transform_indices = @transform_12, window_bounds = array<i64: 1, 32>}, {pipeline_mode = #tpu.pipeline_mode<synchronous>, transform_indices = @transform_13, window_bounds = array<i64: 4, 32>}, {transform_indices = @transform_14, window_bounds = array<i64: 8, 32>}]} {
    %c0 = arith.constant 0 : index
    %c0_0 = arith.constant 0 : index
    %0 = vector.load %arg1[%c0, %c0_0] : memref<8x32xf32, #tpu.memory_space<vmem>>, vector<8x32xf32>
    %1 = arith.truncf %0 : vector<8x32xf32> to vector<8x32xbf16>
    %c0_1 = arith.constant 0 : index
    %c0_2 = arith.constant 0 : index
    %2 = vector.load %arg2[%c0_1, %c0_2] : memref<32x32xbf16, #tpu.memory_space<vmem>>, vector<32x32xbf16>
    %cst = arith.constant dense<0.000000e+00> : vector<8x32xf32>
    %3 = tpu.matmul %1, %2, %cst {dimension_numbers = #tpu.dot_dimension_numbers<[1], [0], [0], [1], [0, 0, 1, 1], [], []>} : vector<8x32xbf16>, vector<32x32xbf16>, vector<8x32xf32> -> vector<8x32xf32>
    %c0_3 = arith.constant 0 : index
    %c0_4 = arith.constant 0 : index
    %4 = vector.load %arg3[%c0_3, %c0_4] : memref<1x32xf32, #tpu.memory_space<vmem>>, vector<1x32xf32>
    %5 = vector.broadcast %4 : vector<1x32xf32> to vector<8x32xf32>
    %6 = arith.addf %3, %5 : vector<8x32xf32>
    %7 = arith.truncf %6 : vector<8x32xf32> to vector<8x32xbf16>
    %c0_5 = arith.constant 0 : index
    %c0_6 = arith.constant 0 : index
    %8 = vector.load %arg4[%c0_5, %c0_6] : memref<32x32xbf16, #tpu.memory_space<vmem>>, vector<32x32xbf16>
    %cst_7 = arith.constant dense<0.000000e+00> : vector<8x32xf32>
    %9 = tpu.matmul %1, %8, %cst_7 {dimension_numbers = #tpu.dot_dimension_numbers<[1], [0], [0], [1], [0, 0, 1, 1], [], []>} : vector<8x32xbf16>, vector<32x32xbf16>, vector<8x32xf32> -> vector<8x32xf32>
    %c0_8 = arith.constant 0 : index
    %c0_9 = arith.constant 0 : index
    %10 = vector.load %arg5[%c0_8, %c0_9] : memref<1x32xf32, #tpu.memory_space<vmem>>, vector<1x32xf32>
    %11 = vector.broadcast %10 : vector<1x32xf32> to vector<8x32xf32>
    %12 = arith.addf %9, %11 : vector<8x32xf32>
    %13 = arith.truncf %12 : vector<8x32xf32> to vector<8x32xbf16>
    %c0_10 = arith.constant 0 : index
    %c0_11 = arith.constant 0 : index
    %14 = vector.load %arg6[%c0_10, %c0_11] : memref<32x32xbf16, #tpu.memory_space<vmem>>, vector<32x32xbf16>
    %cst_12 = arith.constant dense<0.000000e+00> : vector<8x32xf32>
    %15 = tpu.matmul %1, %14, %cst_12 {dimension_numbers = #tpu.dot_dimension_numbers<[1], [0], [0], [1], [0, 0, 1, 1], [], []>} : vector<8x32xbf16>, vector<32x32xbf16>, vector<8x32xf32> -> vector<8x32xf32>
    %c0_13 = arith.constant 0 : index
    %c0_14 = arith.constant 0 : index
    %16 = vector.load %arg7[%c0_13, %c0_14] : memref<1x32xf32, #tpu.memory_space<vmem>>, vector<1x32xf32>
    %17 = vector.broadcast %16 : vector<1x32xf32> to vector<8x32xf32>
    %18 = arith.addf %15, %17 : vector<8x32xf32>
    %19 = arith.truncf %18 : vector<8x32xf32> to vector<8x32xbf16>
    %c0_15 = arith.constant 0 : index
    %c0_16 = arith.constant 0 : index
    %20 = vector.load %arg14[%c0_15, %c0_16] : memref<4x32xf32, #tpu.memory_space<vmem>>, vector<4x32xf32>
    %c0_17 = arith.constant 0 : index
    %c0_18 = arith.constant 0 : index
    %21 = vector.load %arg8[%c0_17, %c0_18] : memref<32x4xbf16, #tpu.memory_space<vmem>>, vector<32x4xbf16>
    %cst_19 = arith.constant dense<0.000000e+00> : vector<8x4xf32>
    %22 = tpu.matmul %7, %21, %cst_19 {dimension_numbers = #tpu.dot_dimension_numbers<[1], [0], [0], [1], [0, 0, 1, 1], [], []>} : vector<8x32xbf16>, vector<32x4xbf16>, vector<8x4xf32> -> vector<8x4xf32>
    %c0_20 = arith.constant 0 : index
    %c0_21 = arith.constant 0 : index
    %23 = vector.load %arg9[%c0_20, %c0_21] : memref<1x4xf32, #tpu.memory_space<vmem>>, vector<1x4xf32>
    %24 = vector.broadcast %23 : vector<1x4xf32> to vector<8x4xf32>
    %25 = arith.addf %22, %24 : vector<8x4xf32>
    %26 = vector.shape_cast %25 : vector<8x4xf32> to vector<1x8x4xf32>
    %cst_22 = arith.constant dense<0xFF800000> : vector<1x4xf32>
    %27 = vector.multi_reduction <maximumf>, %26, %cst_22 [1] : vector<1x8x4xf32> to vector<1x4xf32>
    %28 = vector.shape_cast %27 : vector<1x4xf32> to vector<1x1x4xf32>
    %29 = vector.broadcast %28 : vector<1x1x4xf32> to vector<1x8x4xf32>
    %30 = arith.subf %26, %29 : vector<1x8x4xf32>
    %31 = math.exp %30 : vector<1x8x4xf32>
    %cst_23 = arith.constant dense<0.000000e+00> : vector<1x4xf32>
    %32 = vector.multi_reduction <add>, %31, %cst_23 [1] : vector<1x8x4xf32> to vector<1x4xf32>
    %33 = vector.shape_cast %32 : vector<1x4xf32> to vector<1x1x4xf32>
    %34 = tpu.reciprocal %33 {approx = true} : vector<1x1x4xf32> -> vector<1x1x4xf32>
    %35 = vector.broadcast %34 : vector<1x1x4xf32> to vector<1x8x4xf32>
    %36 = arith.mulf %31, %35 : vector<1x8x4xf32>
    %37 = vector.shape_cast %7 : vector<8x32xbf16> to vector<1x8x32xbf16>
    %38 = arith.truncf %36 : vector<1x8x4xf32> to vector<1x8x4xbf16>
    "tpu.trace_start"() <{level = 10 : i32, message = "bsh,bsd->bhd"}> : () -> ()
    %cst_24 = arith.constant dense<0.000000e+00> : vector<1x4x32xf32>
    %39 = tpu.matmul %38, %37, %cst_24 {dimension_numbers = #tpu.dot_dimension_numbers<[1], [1], [2], [2], [0, 0, 0, 2, 1, 2], [0], [0]>} : vector<1x8x4xbf16>, vector<1x8x32xbf16>, vector<1x4x32xf32> -> vector<1x4x32xf32>
    "tpu.trace_stop"() : () -> ()
    %40 = vector.shape_cast %20 : vector<4x32xf32> to vector<1x4x32xf32>
    %41 = arith.mulf %39, %40 : vector<1x4x32xf32>
    %cst_25 = arith.constant dense<0.000000e+00> : vector<1x32xf32>
    %42 = vector.multi_reduction <add>, %41, %cst_25 [1] : vector<1x4x32xf32> to vector<1x32xf32>
    %43 = vector.shape_cast %19 : vector<8x32xbf16> to vector<1x8x32xbf16>
    %44 = arith.extf %43 : vector<1x8x32xbf16> to vector<1x8x32xf32>
    %45 = vector.shape_cast %42 : vector<1x32xf32> to vector<1x1x32xf32>
    %46 = vector.broadcast %45 : vector<1x1x32xf32> to vector<1x8x32xf32>
    %47 = arith.mulf %44, %46 : vector<1x8x32xf32>
    %48 = arith.truncf %47 : vector<1x8x32xf32> to vector<1x8x32xbf16>
    %49 = vector.shape_cast %48 : vector<1x8x32xbf16> to vector<8x32xbf16>
    %c0_26 = arith.constant 0 : index
    %c0_27 = arith.constant 0 : index
    %50 = vector.load %arg10[%c0_26, %c0_27] : memref<32x4xbf16, #tpu.memory_space<vmem>>, vector<32x4xbf16>
    %cst_28 = arith.constant dense<0.000000e+00> : vector<8x4xf32>
    %51 = tpu.matmul %49, %50, %cst_28 {dimension_numbers = #tpu.dot_dimension_numbers<[1], [0], [0], [1], [0, 0, 1, 1], [], []>} : vector<8x32xbf16>, vector<32x4xbf16>, vector<8x4xf32> -> vector<8x4xf32>
    %c0_29 = arith.constant 0 : index
    %c0_30 = arith.constant 0 : index
    %52 = vector.load %arg11[%c0_29, %c0_30] : memref<1x4xf32, #tpu.memory_space<vmem>>, vector<1x4xf32>
    %53 = vector.broadcast %52 : vector<1x4xf32> to vector<8x4xf32>
    %54 = arith.addf %51, %53 : vector<8x4xf32>
    %55 = vector.shape_cast %54 : vector<8x4xf32> to vector<1x8x4xf32>
    %cst_31 = arith.constant dense<0xFF800000> : vector<1x4xf32>
    %56 = vector.multi_reduction <maximumf>, %55, %cst_31 [1] : vector<1x8x4xf32> to vector<1x4xf32>
    %57 = vector.shape_cast %56 : vector<1x4xf32> to vector<1x1x4xf32>
    %58 = vector.broadcast %57 : vector<1x1x4xf32> to vector<1x8x4xf32>
    %59 = arith.subf %55, %58 : vector<1x8x4xf32>
    %60 = math.exp %59 : vector<1x8x4xf32>
    %cst_32 = arith.constant dense<0.000000e+00> : vector<1x4xf32>
    %61 = vector.multi_reduction <add>, %60, %cst_32 [1] : vector<1x8x4xf32> to vector<1x4xf32>
    %62 = vector.shape_cast %61 : vector<1x4xf32> to vector<1x1x4xf32>
    %63 = tpu.reciprocal %62 {approx = true} : vector<1x1x4xf32> -> vector<1x1x4xf32>
    %64 = vector.broadcast %63 : vector<1x1x4xf32> to vector<1x8x4xf32>
    %65 = arith.mulf %60, %64 : vector<1x8x4xf32>
    %66 = arith.truncf %65 : vector<1x8x4xf32> to vector<1x8x4xbf16>
    "tpu.trace_start"() <{level = 10 : i32, message = "bsh,bsd->bhd"}> : () -> ()
    %cst_33 = arith.constant dense<0.000000e+00> : vector<1x4x32xf32>
    %67 = tpu.matmul %66, %48, %cst_33 {dimension_numbers = #tpu.dot_dimension_numbers<[1], [1], [2], [2], [0, 0, 0, 2, 1, 2], [0], [0]>} : vector<1x8x4xbf16>, vector<1x8x32xbf16>, vector<1x4x32xf32> -> vector<1x4x32xf32>
    "tpu.trace_stop"() : () -> ()
    %68 = vector.shape_cast %20 : vector<4x32xf32> to vector<1x4x32xf32>
    %69 = arith.mulf %67, %68 : vector<1x4x32xf32>
    %cst_34 = arith.constant dense<0.000000e+00> : vector<1x32xf32>
    %70 = vector.multi_reduction <add>, %69, %cst_34 [1] : vector<1x4x32xf32> to vector<1x32xf32>
    %71 = vector.shape_cast %13 : vector<8x32xbf16> to vector<1x8x32xbf16>
    %72 = arith.extf %71 : vector<1x8x32xbf16> to vector<1x8x32xf32>
    %73 = vector.shape_cast %70 : vector<1x32xf32> to vector<1x1x32xf32>
    %74 = vector.broadcast %73 : vector<1x1x32xf32> to vector<1x8x32xf32>
    %75 = arith.mulf %72, %74 : vector<1x8x32xf32>
    %76 = arith.truncf %75 : vector<1x8x32xf32> to vector<1x8x32xbf16>
    %77 = vector.shape_cast %76 : vector<1x8x32xbf16> to vector<8x32xbf16>
    %78 = arith.extf %7 : vector<8x32xbf16> to vector<8x32xf32>
    %c0_35 = arith.constant 0 : index
    %c0_36 = arith.constant 0 : index
    %79 = vector.load %arg12[%c0_35, %c0_36] : memref<32x32xbf16, #tpu.memory_space<vmem>>, vector<32x32xbf16>
    %cst_37 = arith.constant dense<0.000000e+00> : vector<8x32xf32>
    %80 = tpu.matmul %77, %79, %cst_37 {dimension_numbers = #tpu.dot_dimension_numbers<[1], [0], [0], [1], [0, 0, 1, 1], [], []>} : vector<8x32xbf16>, vector<32x32xbf16>, vector<8x32xf32> -> vector<8x32xf32>
    %81 = arith.addf %78, %80 : vector<8x32xf32>
    %c0_38 = arith.constant 0 : index
    %c0_39 = arith.constant 0 : index
    %82 = vector.load %arg13[%c0_38, %c0_39] : memref<1x32xf32, #tpu.memory_space<vmem>>, vector<1x32xf32>
    %83 = vector.broadcast %82 : vector<1x32xf32> to vector<8x32xf32>
    %84 = arith.addf %81, %83 : vector<8x32xf32>
    %c0_40 = arith.constant 0 : index
    %c0_41 = arith.constant 0 : index
    %85 = vector.load %arg15[%c0_40, %c0_41] : memref<8x32xf32, #tpu.memory_space<vmem>>, vector<8x32xf32>
    tpu.vector_store %arg15[%c0_40, %c0_41], %84 {strides = array<i32>} : memref<8x32xf32, #tpu.memory_space<vmem>>, vector<8x32xf32>,
    return
  }
  func.func @transform_0(%arg0: i32) -> (i32, i32) {
    %c0_i32 = arith.constant 0 : i32
    %c0_i32_0 = arith.constant 0 : i32
    return %arg0, %c0_i32 : i32, i32
  }
  func.func @transform_1(%arg0: i32) -> (i32, i32) {
    %c0_i32 = arith.constant 0 : i32
    %c0_i32_0 = arith.constant 0 : i32
    %c0_i32_1 = arith.constant 0 : i32
    return %c0_i32, %c0_i32_0 : i32, i32
  }
  func.func @transform_2(%arg0: i32) -> (i32, i32) {
    %c0_i32 = arith.constant 0 : i32
    %c0_i32_0 = arith.constant 0 : i32
    %c0_i32_1 = arith.constant 0 : i32
    return %c0_i32, %c0_i32_0 : i32, i32
  }
  func.func @transform_3(%arg0: i32) -> (i32, i32) {
    %c0_i32 = arith.constant 0 : i32
    %c0_i32_0 = arith.constant 0 : i32
    %c0_i32_1 = arith.constant 0 : i32
    return %c0_i32, %c0_i32_0 : i32, i32
  }
  func.func @transform_4(%arg0: i32) -> (i32, i32) {
    %c0_i32 = arith.constant 0 : i32
    %c0_i32_0 = arith.constant 0 : i32
    %c0_i32_1 = arith.constant 0 : i32
    return %c0_i32, %c0_i32_0 : i32, i32
  }
  func.func @transform_5(%arg0: i32) -> (i32, i32) {
    %c0_i32 = arith.constant 0 : i32
    %c0_i32_0 = arith.constant 0 : i32
    %c0_i32_1 = arith.constant 0 : i32
    return %c0_i32, %c0_i32_0 : i32, i32
  }
  func.func @transform_6(%arg0: i32) -> (i32, i32) {
    %c0_i32 = arith.constant 0 : i32
    %c0_i32_0 = arith.constant 0 : i32
    %c0_i32_1 = arith.constant 0 : i32
    return %c0_i32, %c0_i32_0 : i32, i32
  }
  func.func @transform_7(%arg0: i32) -> (i32, i32) {
    %c0_i32 = arith.constant 0 : i32
    %c0_i32_0 = arith.constant 0 : i32
    %c0_i32_1 = arith.constant 0 : i32
    return %c0_i32, %c0_i32_0 : i32, i32
  }
  func.func @transform_8(%arg0: i32) -> (i32, i32) {
    %c0_i32 = arith.constant 0 : i32
    %c0_i32_0 = arith.constant 0 : i32
    %c0_i32_1 = arith.constant 0 : i32
    return %c0_i32, %c0_i32_0 : i32, i32
  }
  func.func @transform_9(%arg0: i32) -> (i32, i32) {
    %c0_i32 = arith.constant 0 : i32
    %c0_i32_0 = arith.constant 0 : i32
    %c0_i32_1 = arith.constant 0 : i32
    return %c0_i32, %c0_i32_0 : i32, i32
  }
  func.func @transform_10(%arg0: i32) -> (i32, i32) {
    %c0_i32 = arith.constant 0 : i32
    %c0_i32_0 = arith.constant 0 : i32
    %c0_i32_1 = arith.constant 0 : i32
    return %c0_i32, %c0_i32_0 : i32, i32
  }
  func.func @transform_11(%arg0: i32) -> (i32, i32) {
    %c0_i32 = arith.constant 0 : i32
    %c0_i32_0 = arith.constant 0 : i32
    %c0_i32_1 = arith.constant 0 : i32
    return %c0_i32, %c0_i32_0 : i32, i32
  }
  func.func @transform_12(%arg0: i32) -> (i32, i32) {
    %c0_i32 = arith.constant 0 : i32
    %c0_i32_0 = arith.constant 0 : i32
    %c0_i32_1 = arith.constant 0 : i32
    return %c0_i32, %c0_i32_0 : i32, i32
  }
  func.func @transform_13(%arg0: i32) -> (i32, i32) {
    %c0_i32 = arith.constant 0 : i32
    %c0_i32_0 = arith.constant 0 : i32
    %c0_i32_1 = arith.constant 0 : i32
    return %c0_i32, %c0_i32_0 : i32, i32
  }
  func.func @transform_14(%arg0: i32) -> (i32, i32) {
    %c0_i32 = arith.constant 0 : i32
    %c0_i32_0 = arith.constant 0 : i32
    return %arg0, %c0_i32 : i32, i32
  }
}

module attributes {stable_mosaic.version = 11 : i64} {
  func.func @additive_attention_kernel(%arg0: i32, %arg1: memref<8x32xf32, #tpu.memory_space<vmem>>, %arg2: memref<32x32xbf16, #tpu.memory_space<vmem>>, %arg3: memref<1x32xf32, #tpu.memory_space<vmem>>, %arg4: memref<32x32xbf16, #tpu.memory_space<vmem>>, %arg5: memref<1x32xf32, #tpu.memory_space<vmem>>, %arg6: memref<32x32xbf16, #tpu.memory_space<vmem>>, %arg7: memref<1x32xf32, #tpu.memory_space<vmem>>, %arg8: memref<32x4xbf16, #tpu.memory_space<vmem>>, %arg9: memref<1x4xf32, #tpu.memory_space<vmem>>, %arg10: memref<32x4xbf16, #tpu.memory_space<vmem>>, %arg11: memref<1x4xf32, #tpu.memory_space<vmem>>, %arg12: memref<32x32xbf16, #tpu.memory_space<vmem>>, %arg13: memref<1x32xf32, #tpu.memory_space<vmem>>, %arg14: memref<4x32xf32, #tpu.memory_space<vmem>>, %arg15: memref<8x32xf32, #tpu.memory_space<vmem>>) attributes {dimension_semantics = [#tpu.dimension_semantics<parallel>], iteration_bounds = array<i64: 2>, scalar_prefetch = 0 : i64, scratch_operands = 0 : i64, tpu.core_type = #tpu.core_type<tc>, window_params = [{transform_indices = @transform_0, window_bounds = array<i64: 8, 32>}, {pipeline_mode = #tpu.pipeline_mode<synchronous>, transform_indices = @transform_1, window_bounds = array<i64: 32, 32>}, {pipeline_mode = #tpu.pipeline_mode<synchronous>, transform_indices = @transform_2, window_bounds = array<i64: 1, 32>}, {pipeline_mode = #tpu.pipeline_mode<synchronous>, transform_indices = @transform_3, window_bounds = array<i64: 32, 32>}, {pipeline_mode = #tpu.pipeline_mode<synchronous>, transform_indices = @transform_4, window_bounds = array<i64: 1, 32>}, {pipeline_mode = #tpu.pipeline_mode<synchronous>, transform_indices = @transform_5, window_bounds = array<i64: 32, 32>}, {pipeline_mode = #tpu.pipeline_mode<synchronous>, transform_indices = @transform_6, window_bounds = array<i64: 1, 32>}, {pipeline_mode = #tpu.pipeline_mode<synchronous>, transform_indices = @transform_7, window_bounds = array<i64: 32, 4>}, {pipeline_mode = #tpu.pipeline_mode<synchronous>, transform_indices = @transform_8, window_bounds = array<i64: 1, 4>}, {pipeline_mode = #tpu.pipeline_mode<synchronous>, transform_indices = @transform_9, window_bounds = array<i64: 32, 4>}, {pipeline_mode = #tpu.pipeline_mode<synchronous>, transform_indices = @transform_10, window_bounds = array<i64: 1, 4>}, {pipeline_mode = #tpu.pipeline_mode<synchronous>, transform_indices = @transform_11, window_bounds = array<i64: 32, 32>}, {pipeline_mode = #tpu.pipeline_mode<synchronous>, transform_indices = @transform_12, window_bounds = array<i64: 1, 32>}, {pipeline_mode = #tpu.pipeline_mode<synchronous>, transform_indices = @transform_13, window_bounds = array<i64: 4, 32>}, {transform_indices = @transform_14, window_bounds = array<i64: 8, 32>}]} {
    %c0 = arith.constant 0 : index
    %c0_0 = arith.constant 0 : index
    %0 = vector.load %arg1[%c0, %c0_0] : memref<8x32xf32, #tpu.memory_space<vmem>>, vector<8x32xf32>
    %1 = arith.truncf %0 : vector<8x32xf32> to vector<8x32xbf16>
    %c0_1 = arith.constant 0 : index
    %c0_2 = arith.constant 0 : index
    %2 = vector.load %arg2[%c0_1, %c0_2] : memref<32x32xbf16, #tpu.memory_space<vmem>>, vector<32x32xbf16>
    %cst = arith.constant dense<0.000000e+00> : vector<8x32xf32>
    %3 = tpu.matmul %1, %2, %cst {dimension_numbers = #tpu.dot_dimension_numbers<[1], [0], [0], [1], [0, 0, 1, 1], [], []>} : vector<8x32xbf16>, vector<32x32xbf16>, vector<8x32xf32> -> vector<8x32xf32>
    %c0_3 = arith.constant 0 : index
    %c0_4 = arith.constant 0 : index
    %4 = vector.load %arg3[%c0_3, %c0_4] : memref<1x32xf32, #tpu.memory_space<vmem>>, vector<1x32xf32>
    %5 = vector.broadcast %4 : vector<1x32xf32> to vector<8x32xf32>
    %6 = arith.addf %3, %5 : vector<8x32xf32>
    %7 = arith.truncf %6 : vector<8x32xf32> to vector<8x32xbf16>
    %c0_5 = arith.constant 0 : index
    %c0_6 = arith.constant 0 : index
    %8 = vector.load %arg4[%c0_5, %c0_6] : memref<32x32xbf16, #tpu.memory_space<vmem>>, vector<32x32xbf16>
    %cst_7 = arith.constant dense<0.000000e+00> : vector<8x32xf32>
    %9 = tpu.matmul %1, %8, %cst_7 {dimension_numbers = #tpu.dot_dimension_numbers<[1], [0], [0], [1], [0, 0, 1, 1], [], []>} : vector<8x32xbf16>, vector<32x32xbf16>, vector<8x32xf32> -> vector<8x32xf32>
    %c0_8 = arith.constant 0 : index
    %c0_9 = arith.constant 0 : index
    %10 = vector.load %arg5[%c0_8, %c0_9] : memref<1x32xf32, #tpu.memory_space<vmem>>, vector<1x32xf32>
    %11 = vector.broadcast %10 : vector<1x32xf32> to vector<8x32xf32>
    %12 = arith.addf %9, %11 : vector<8x32xf32>
    %13 = arith.truncf %12 : vector<8x32xf32> to vector<8x32xbf16>
    %c0_10 = arith.constant 0 : index
    %c0_11 = arith.constant 0 : index
    %14 = vector.load %arg6[%c0_10, %c0_11] : memref<32x32xbf16, #tpu.memory_space<vmem>>, vector<32x32xbf16>
    %cst_12 = arith.constant dense<0.000000e+00> : vector<8x32xf32>
    %15 = tpu.matmul %1, %14, %cst_12 {dimension_numbers = #tpu.dot_dimension_numbers<[1], [0], [0], [1], [0, 0, 1, 1], [], []>} : vector<8x32xbf16>, vector<32x32xbf16>, vector<8x32xf32> -> vector<8x32xf32>
    %c0_13 = arith.constant 0 : index
    %c0_14 = arith.constant 0 : index
    %16 = vector.load %arg7[%c0_13, %c0_14] : memref<1x32xf32, #tpu.memory_space<vmem>>, vector<1x32xf32>
    %17 = vector.broadcast %16 : vector<1x32xf32> to vector<8x32xf32>
    %18 = arith.addf %15, %17 : vector<8x32xf32>
    %19 = arith.truncf %18 : vector<8x32xf32> to vector<8x32xbf16>
    %c0_15 = arith.constant 0 : index
    %c0_16 = arith.constant 0 : index
    %20 = vector.load %arg14[%c0_15, %c0_16] : memref<4x32xf32, #tpu.memory_space<vmem>>, vector<4x32xf32>
    %c0_17 = arith.constant 0 : index
    %c0_18 = arith.constant 0 : index
    %21 = vector.load %arg8[%c0_17, %c0_18] : memref<32x4xbf16, #tpu.memory_space<vmem>>, vector<32x4xbf16>
    %cst_19 = arith.constant dense<0.000000e+00> : vector<8x4xf32>
    %22 = tpu.matmul %7, %21, %cst_19 {dimension_numbers = #tpu.dot_dimension_numbers<[1], [0], [0], [1], [0, 0, 1, 1], [], []>} : vector<8x32xbf16>, vector<32x4xbf16>, vector<8x4xf32> -> vector<8x4xf32>
    %c0_20 = arith.constant 0 : index
    %c0_21 = arith.constant 0 : index
    %23 = vector.load %arg9[%c0_20, %c0_21] : memref<1x4xf32, #tpu.memory_space<vmem>>, vector<1x4xf32>
    %24 = vector.broadcast %23 : vector<1x4xf32> to vector<8x4xf32>
    %25 = arith.addf %22, %24 : vector<8x4xf32>
    %26 = vector.shape_cast %25 : vector<8x4xf32> to vector<1x8x4xf32>
    %cst_22 = arith.constant dense<0xFF800000> : vector<1x4xf32>
    %27 = vector.multi_reduction <maximumf>, %26, %cst_22 [1] : vector<1x8x4xf32> to vector<1x4xf32>
    %28 = vector.shape_cast %27 : vector<1x4xf32> to vector<1x1x4xf32>
    %29 = vector.broadcast %28 : vector<1x1x4xf32> to vector<1x8x4xf32>
    %30 = arith.subf %26, %29 : vector<1x8x4xf32>
    %31 = math.exp %30 : vector<1x8x4xf32>
    %cst_23 = arith.constant dense<0.000000e+00> : vector<1x4xf32>
    %32 = vector.multi_reduction <add>, %31, %cst_23 [1] : vector<1x8x4xf32> to vector<1x4xf32>
    %33 = vector.shape_cast %32 : vector<1x4xf32> to vector<1x1x4xf32>
    %34 = tpu.reciprocal %33 {approx = true} : vector<1x1x4xf32> -> vector<1x1x4xf32>
    %35 = vector.broadcast %34 : vector<1x1x4xf32> to vector<1x8x4xf32>
    %36 = arith.mulf %31, %35 : vector<1x8x4xf32>
    %37 = vector.shape_cast %7 : vector<8x32xbf16> to vector<1x8x32xbf16>
    %38 = arith.truncf %36 : vector<1x8x4xf32> to vector<1x8x4xbf16>
    "tpu.trace_start"() <{level = 10 : i32, message = "bsh,bsd->bhd"}> : () -> ()
    %cst_24 = arith.constant dense<0.000000e+00> : vector<1x4x32xf32>
    %39 = tpu.matmul %38, %37, %cst_24 {dimension_numbers = #tpu.dot_dimension_numbers<[1], [1], [2], [2], [0, 0, 0, 2, 1, 2], [0], [0]>} : vector<1x8x4xbf16>, vector<1x8x32xbf16>, vector<1x4x32xf32> -> vector<1x4x32xf32>
    "tpu.trace_stop"() : () -> ()
    %40 = vector.shape_cast %20 : vector<4x32xf32> to vector<1x4x32xf32>
    %41 = arith.mulf %39, %40 : vector<1x4x32xf32>
    %cst_25 = arith.constant dense<0.000000e+00> : vector<1x32xf32>
    %42 = vector.multi_reduction <add>, %41, %cst_25 [1] : vector<1x4x32xf32> to vector<1x32xf32>
    %43 = vector.shape_cast %19 : vector<8x32xbf16> to vector<1x8x32xbf16>
    %44 = arith.extf %43 : vector<1x8x32xbf16> to vector<1x8x32xf32>
    %45 = vector.shape_cast %42 : vector<1x32xf32> to vector<1x1x32xf32>
    %46 = vector.broadcast %45 : vector<1x1x32xf32> to vector<1x8x32xf32>
    %47 = arith.mulf %44, %46 : vector<1x8x32xf32>
    %48 = arith.truncf %47 : vector<1x8x32xf32> to vector<1x8x32xbf16>
    %49 = vector.shape_cast %48 : vector<1x8x32xbf16> to vector<8x32xbf16>
    %c0_26 = arith.constant 0 : index
    %c0_27 = arith.constant 0 : index
    %50 = vector.load %arg10[%c0_26, %c0_27] : memref<32x4xbf16, #tpu.memory_space<vmem>>, vector<32x4xbf16>
    %cst_28 = arith.constant dense<0.000000e+00> : vector<8x4xf32>
    %51 = tpu.matmul %49, %50, %cst_28 {dimension_numbers = #tpu.dot_dimension_numbers<[1], [0], [0], [1], [0, 0, 1, 1], [], []>} : vector<8x32xbf16>, vector<32x4xbf16>, vector<8x4xf32> -> vector<8x4xf32>
    %c0_29 = arith.constant 0 : index
    %c0_30 = arith.constant 0 : index
    %52 = vector.load %arg11[%c0_29, %c0_30] : memref<1x4xf32, #tpu.memory_space<vmem>>, vector<1x4xf32>
    %53 = vector.broadcast %52 : vector<1x4xf32> to vector<8x4xf32>
    %54 = arith.addf %51, %53 : vector<8x4xf32>
    %55 = vector.shape_cast %54 : vector<8x4xf32> to vector<1x8x4xf32>
    %cst_31 = arith.constant dense<0xFF800000> : vector<1x4xf32>
    %56 = vector.multi_reduction <maximumf>, %55, %cst_31 [1] : vector<1x8x4xf32> to vector<1x4xf32>
    %57 = vector.shape_cast %56 : vector<1x4xf32> to vector<1x1x4xf32>
    %58 = vector.broadcast %57 : vector<1x1x4xf32> to vector<1x8x4xf32>
    %59 = arith.subf %55, %58 : vector<1x8x4xf32>
    %60 = math.exp %59 : vector<1x8x4xf32>
    %cst_32 = arith.constant dense<0.000000e+00> : vector<1x4xf32>
    %61 = vector.multi_reduction <add>, %60, %cst_32 [1] : vector<1x8x4xf32> to vector<1x4xf32>
    %62 = vector.shape_cast %61 : vector<1x4xf32> to vector<1x1x4xf32>
    %63 = tpu.reciprocal %62 {approx = true} : vector<1x1x4xf32> -> vector<1x1x4xf32>
    %64 = vector.broadcast %63 : vector<1x1x4xf32> to vector<1x8x4xf32>
    %65 = arith.mulf %60, %64 : vector<1x8x4xf32>
    %66 = arith.truncf %65 : vector<1x8x4xf32> to vector<1x8x4xbf16>
    "tpu.trace_start"() <{level = 10 : i32, message = "bsh,bsd->bhd"}> : () -> ()
    %cst_33 = arith.constant dense<0.000000e+00> : vector<1x4x32xf32>
    %67 = tpu.matmul %66, %48, %cst_33 {dimension_numbers = #tpu.dot_dimension_numbers<[1], [1], [2], [2], [0, 0, 0, 2, 1, 2], [0], [0]>} : vector<1x8x4xbf16>, vector<1x8x32xbf16>, vector<1x4x32xf32> -> vector<1x4x32xf32>
    "tpu.trace_stop"() : () -> ()
    %68 = vector.shape_cast %20 : vector<4x32xf32> to vector<1x4x32xf32>
    %69 = arith.mulf %67, %68 : vector<1x4x32xf32>
    %cst_34 = arith.constant dense<0.000000e+00> : vector<1x32xf32>
    %70 = vector.multi_reduction <add>, %69, %cst_34 [1] : vector<1x4x32xf32> to vector<1x32xf32>
    %71 = vector.shape_cast %13 : vector<8x32xbf16> to vector<1x8x32xbf16>
    %72 = arith.extf %71 : vector<1x8x32xbf16> to vector<1x8x32xf32>
    %73 = vector.shape_cast %70 : vector<1x32xf32> to vector<1x1x32xf32>
    %74 = vector.broadcast %73 : vector<1x1x32xf32> to vector<1x8x32xf32>
    %75 = arith.mulf %72, %74 : vector<1x8x32xf32>
    %76 = arith.truncf %75 : vector<1x8x32xf32> to vector<1x8x32xbf16>
    %77 = vector.shape_cast %76 : vector<1x8x32xbf16> to vector<8x32xbf16>
    %78 = arith.extf %7 : vector<8x32xbf16> to vector<8x32xf32>
    %c0_35 = arith.constant 0 : index
    %c0_36 = arith.constant 0 : index
    %79 = vector.load %arg12[%c0_35, %c0_36] : memref<32x32xbf16, #tpu.memory_space<vmem>>, vector<32x32xbf16>
    %cst_37 = arith.constant dense<0.000000e+00> : vector<8x32xf32>
    %80 = tpu.matmul %77, %79, %cst_37 {dimension_numbers = #tpu.dot_dimension_numbers<[1], [0], [0], [1], [0, 0, 1, 1], [], []>} : vector<8x32xbf16>, vector<32x32xbf16>, vector<8x32xf32> -> vector<8x32xf32>
    %81 = arith.addf %78, %80 : vector<8x32xf32>
    %c0_38 = arith.constant 0 : index
    %c0_39 = arith.constant 0 : index
    %82 = vector.load %arg13[%c0_38, %c0_39] : memref<1x32xf32, #tpu.memory_space<vmem>>, vector<1x32xf32>
    %83 = vector.broadcast %82 : vector<1x32xf32> to vector<8x32xf32>
    %84 = arith.addf %81, %83 : vector<8x32xf32>
    %c0_40 = arith.constant 0 : index
    %c0_41 = arith.constant 0 : index
    %85 = vector.load %arg15[%c0_40, %c0_41] : memref<8x32xf32, #tpu.memory_space<vmem>>, vector<8x32xf32>
    tpu.vector_store %arg15[%c0_40, %c0_41], %84 {strides = array<i32>} : memref<8x32xf32, #tpu.memory_space<vmem>>, vector<8x32xf32>,
    return
  }
  func.func @transform_0(%arg0: i32) -> (i32, i32) {
    %c0_i32 = arith.constant 0 : i32
    %c0_i32_0 = arith.constant 0 : i32
    return %arg0, %c0_i32 : i32, i32
  }
  func.func @transform_1(%arg0: i32) -> (i32, i32) {
    %c0_i32 = arith.constant 0 : i32
    %c0_i32_0 = arith.constant 0 : i32
    %c0_i32_1 = arith.constant 0 : i32
    return %c0_i32, %c0_i32_0 : i32, i32
  }
  func.func @transform_2(%arg0: i32) -> (i32, i32) {
    %c0_i32 = arith.constant 0 : i32
    %c0_i32_0 = arith.constant 0 : i32
    %c0_i32_1 = arith.constant 0 : i32
    return %c0_i32, %c0_i32_0 : i32, i32
  }
  func.func @transform_3(%arg0: i32) -> (i32, i32) {
    %c0_i32 = arith.constant 0 : i32
    %c0_i32_0 = arith.constant 0 : i32
    %c0_i32_1 = arith.constant 0 : i32
    return %c0_i32, %c0_i32_0 : i32, i32
  }
  func.func @transform_4(%arg0: i32) -> (i32, i32) {
    %c0_i32 = arith.constant 0 : i32
    %c0_i32_0 = arith.constant 0 : i32
    %c0_i32_1 = arith.constant 0 : i32
    return %c0_i32, %c0_i32_0 : i32, i32
  }
  func.func @transform_5(%arg0: i32) -> (i32, i32) {
    %c0_i32 = arith.constant 0 : i32
    %c0_i32_0 = arith.constant 0 : i32
    %c0_i32_1 = arith.constant 0 : i32
    return %c0_i32, %c0_i32_0 : i32, i32
  }
  func.func @transform_6(%arg0: i32) -> (i32, i32) {
    %c0_i32 = arith.constant 0 : i32
    %c0_i32_0 = arith.constant 0 : i32
    %c0_i32_1 = arith.constant 0 : i32
    return %c0_i32, %c0_i32_0 : i32, i32
  }
  func.func @transform_7(%arg0: i32) -> (i32, i32) {
    %c0_i32 = arith.constant 0 : i32
    %c0_i32_0 = arith.constant 0 : i32
    %c0_i32_1 = arith.constant 0 : i32
    return %c0_i32, %c0_i32_0 : i32, i32
  }
  func.func @transform_8(%arg0: i32) -> (i32, i32) {
    %c0_i32 = arith.constant 0 : i32
    %c0_i32_0 = arith.constant 0 : i32
    %c0_i32_1 = arith.constant 0 : i32
    return %c0_i32, %c0_i32_0 : i32, i32
  }
  func.func @transform_9(%arg0: i32) -> (i32, i32) {
    %c0_i32 = arith.constant 0 : i32
    %c0_i32_0 = arith.constant 0 : i32
    %c0_i32_1 = arith.constant 0 : i32
    return %c0_i32, %c0_i32_0 : i32, i32
  }
  func.func @transform_10(%arg0: i32) -> (i32, i32) {
    %c0_i32 = arith.constant 0 : i32
    %c0_i32_0 = arith.constant 0 : i32
    %c0_i32_1 = arith.constant 0 : i32
    return %c0_i32, %c0_i32_0 : i32, i32
  }
  func.func @transform_11(%arg0: i32) -> (i32, i32) {
    %c0_i32 = arith.constant 0 : i32
    %c0_i32_0 = arith.constant 0 : i32
    %c0_i32_1 = arith.constant 0 : i32
    return %c0_i32, %c0_i32_0 : i32, i32
  }
  func.func @transform_12(%arg0: i32) -> (i32, i32) {
    %c0_i32 = arith.constant 0 : i32
    %c0_i32_0 = arith.constant 0 : i32
    %c0_i32_1 = arith.constant 0 : i32
    return %c0_i32, %c0_i32_0 : i32, i32
  }
  func.func @transform_13(%arg0: i32) -> (i32, i32) {
    %c0_i32 = arith.constant 0 : i32
    %c0_i32_0 = arith.constant 0 : i32
    %c0_i32_1 = arith.constant 0 : i32
    return %c0_i32, %c0_i32_0 : i32, i32
  }
  func.func @transform_14(%arg0: i32) -> (i32, i32) {
    %c0_i32 = arith.constant 0 : i32
    %c0_i32_0 = arith.constant 0 : i32
    return %arg0, %c0_i32 : i32, i32
  }
}

</mosaic_0001>

<bundles_post_ra>
// kernel: tpu_custom_call.1
= control target key start
LH: loop header
LB: loop body
LE: loop exit
PB: predicated region body
PF: predicated region fallthrough
CT: control target
= control target key end

     0   :  { %19 = vsyncpa [#allocation3], 0  ;;  %s2107_s0 = inlined_call_operand.vmem [shape: f32[16,32], index: 0, kind: input, shape index: {}]   ;;  %s2108_s1 = inlined_call_operand.vmem [shape: bf16[32,32], index: 1, kind: input, shape index: {}]   ;;  %s2109_s2 = inlined_call_operand.hbm [shape: f32[1,32], index: 2, kind: input, shape index: {}]   ;;  %s2110_s3 = inlined_call_operand.hbm [shape: bf16[32,32], index: 3, kind: input, shape index: {}]   ;;  %s2111_s4 = inlined_call_operand.hbm [shape: f32[1,32], index: 4, kind: input, shape index: {}]   ;;  %s2112_s5 = inlined_call_operand.hbm [shape: bf16[32,32], index: 5, kind: input, shape index: {}]   ;;  %s2113_s6 = inlined_call_operand.hbm [shape: f32[1,32], index: 6, kind: input, shape index: {}]   ;;  %s2114_s7 = inlined_call_operand.vmem [shape: bf16[32,4], index: 7, kind: input, shape index: {}]   ;;  %s2115_s8 = inlined_call_operand.hbm [shape: f32[1,4], index: 8, kind: input, shape index: {}]   ;;  %s2116_s9 = inlined_call_operand.vmem [shape: bf16[32,4], index: 9, kind: input, shape index: {}]   ;;  %s2117_s10 = inlined_call_operand.vmem [shape: f32[1,4], index: 10, kind: input, shape index: {}]   ;;  %s2118_s11 = inlined_call_operand.vmem [shape: bf16[32,32], index: 11, kind: input, shape index: {}]   ;;  %s2119_s12 = inlined_call_operand.vmem [shape: f32[1,32], index: 12, kind: input, shape index: {}]   ;;  %s2120_s13 = inlined_call_operand.vmem [shape: f32[4,32], index: 13, kind: input, shape index: {}]   ;;  %s2121_s14 = inlined_call_operand.hbm [shape: f32[16,32], index: 14, kind: output, shape index: {}]  }
   0x1   :  { %20 = vsyncpa [#allocation6], 0 }
   0x2   :  { %21 = vsyncpa [#allocation9], 0 }
   0x3   :  { %22 = vsyncpa [#allocation12], 0 }
   0x4   :  { %23 = vsyncpa [#allocation4], 0 }
   0x5   :  { %25 = vsyncpa [#allocation4 + $0x1], 0  ;;  %s1841_s29 = smov 0   ;;  %s1843_s30 = smov 0  }
   0x6   :  { %s1845_s15 = smov 0   ;;  %s1847_s16 = smov 0  }
   0x7 LB: > { %2130 = sst [smem:[#allocation19_spill]] %s1741_s29  ;;  %s1862_s17 = sadd.s32 4294967295, %s1753_s16   ;;  %s1753_s16 = sphi %s1847_s16, %s2154_s16   ;;  %s1749_s15 = sphi %s1845_s15, %s2156_s15   ;;  %s1745_s30 = sphi %s1843_s30, %s2158_s30   ;;  %s1741_s29 = sphi %s1841_s29, %s2157_s29  }
   0x8   : > { %2131 = sst [smem:[#allocation20_spill]] %s1749_s15  ;;  %s1266_s18 = sadd.s32 4294967294, %s1753_s16  }
   0x9   : > { %2132 = sst [smem:[#allocation21_spill]] %s1753_s16  ;;  %s1866_s19 = sadd.s32 1, %s1753_s16  }
   0xa   : > { %2133 = sst [smem:[#allocation22_spill]] %s1866_s19  ;;  %s337_s20 = sadd.s32 1, %s1749_s15 }
   0xb   : > { %s334_s21 = ssub.s32 %s1753_s16, %s1866_s19  ;;  %p347_p0 = scmp.ne.s32.totalorder %s1749_s15, %s1745_s30 }
   0xc   : > { %p335_p1 = scmp.eq.s32.totalorder %s334_s21, 0  ;;  %p348_p2 = scmp.eq.s32.totalorder %s1862_s17, 1 }
   0xd   : > { %p353_p3 = scmp.ne.s32.totalorder %s1745_s30, %s1741_s29  ;;  %p354_p4 = scmp.eq.s32.totalorder %s1266_s18, 1 }
   0xe   : > { %s1877_s22 = scalar_select %p335_p1, %s1749_s15, %s337_s20  }
   0xf   : > { %p1879_p5 = por %p348_p2, %p347_p0  ;;  %p1883_p6 = por %p354_p4, %p353_p3 }
  0x10   : > { %2134 = sst [smem:[#allocation23_spill]] %s1877_s22  ;;  %p1267_p7 = scmp.ge.s32.totalorder %s1753_s16, 1 }
  0x11   : > { %s2135_s23 = scalar_select %p1879_p5, 1, 0 }
  0x12   : > { %s2136_s24 = scalar_select %p1883_p6, 1, 0 }
  0x13   : > { %p361_p8 = scmp.lt.s32.totalorder %s1753_s16, 3  ;;  %p2127_p9 = scmp.eq.s32.totalorder %s1862_s17, 0 }
  0x14   : > { %2137 = sst [smem:[#allocation24_spill]] %s2136_s24  ;;  %s1755_s26 = smov [#allocation5]  }
  0x15   : > { %p1890_p10 = pnand %p1267_p7, %p361_p8  ;;  %s387_s27 = sshll.u32 %s1755_s26, 4  ;;  %s388_s27 = int_to_ptr.vmem [resolvable:$true] %s387_s27 }
  0x16   : > { %s1756_s18 = smov [#allocation8]   ;;  %s1757_s21 = smov [#allocation2]  }
  0x17   : > { %p1422_p11 = pneg %p1890_p10  ;;  %s411_s20 = sshll.u32 %s1756_s18, 4  ;;  %s412_s20 = int_to_ptr.vmem [resolvable:$true] %s411_s20 }
  0x18   : > { %s377_s22 = sshll.u32 %s1757_s21, 4  ;;  %s1532_s26 = scalar_lea.vmem %s388_s27, 256  ;;  %s378_s22 = int_to_ptr.vmem [resolvable:$true] %s377_s22 }
  0x19   : > { %p1898_p12 = pnand %p2127_p9, %p1422_p11  ;;  %p1533_p0 = scmp.ne.s32.totalorder %s388_s27, %s1532_s26 }
  0x1a   : > { %p1540_p3 = scmp.lt.s32.totalorder %s388_s27, %s388_s27  ;;  %p1541_p4 = scmp.lt.s32.totalorder %s1532_s26, %s1532_s26 }
  0x1b   : > { %p1904_p13 = pneg %p1898_p12 }
  0x1c   : > { %p1542_p7 = por %p1541_p4, %p1540_p3 }
  0x1d   : > { %p1535_p1 = pnand %p1533_p0, %p1904_p13 }
  0x1f   : > { %p1536_p2 = pneg %p1535_p1 }
  0x21   : > { %p1543_p8 = pnand %p1542_p7, %p1536_p2 }
  0x23   : > { %1546 = shalt.err (!%p1543_p8)
}
  0x24   : > { %s1758_s18 = smov 64   ;;  %s1759_s21 = smov 4  }
  0x25   : > { %1428 = dma.hbm_to_vmem [thread:$0]  (!%p1898_p12), %s2110_s3, 256, %s388_s27, [#allocation6], %s1758_s18, %s1758_s18, %s1759_s21  }
  0x26   : > { %s1558_s29 = scalar_lea.vmem %s412_s20, 256  ;;  %p1566_p1 = scmp.lt.s32.totalorder %s412_s20, %s412_s20 }
  0x27   : > { %p1559_p11 = scmp.ne.s32.totalorder %s412_s20, %s1558_s29  ;;  %p1567_p6 = scmp.lt.s32.totalorder %s1558_s29, %s1558_s29 }
  0x29   : > { %p1561_p9 = pnand %p1559_p11, %p1904_p13  ;;  %p1568_p5 = por %p1567_p6, %p1566_p1 }
  0x2b   : > { %p1562_p0 = pneg %p1561_p9 }
  0x2d   : > { %p1569_p3 = pnand %p1568_p5, %p1562_p0 }
  0x2f   : > { %1572 = shalt.err (!%p1569_p3)
}
  0x30   : > { %1434 = dma.hbm_to_vmem [thread:$0]  (!%p1898_p12), %s2112_s5, 256, %s412_s20, [#allocation9], %s1758_s18, %s1758_s18, %s1759_s21  }
  0x31   : > { %s1584_s19 = scalar_lea.vmem %s378_s22, 16  ;;  %s1591_s24 = scalar_lea.vmem %s378_s22, 32 }
  0x32   : > { %p1585_p2 = scmp.ne.s32.totalorder %s378_s22, %s1584_s19  ;;  %p1592_p9 = scmp.lt.s32.totalorder %s378_s22, %s378_s22 }
  0x33   : > { %p1593_p8 = scmp.lt.s32.totalorder %s1591_s24, %s1584_s19 }
  0x34   : > { %p1587_p4 = pnand %p1585_p2, %p1904_p13 }
  0x35   : > { %p1594_p11 = por %p1593_p8, %p1592_p9 }
  0x36   : > { %p1588_p7 = pneg %p1587_p4 }
  0x38   : > { %p1595_p6 = pnand %p1594_p11, %p1588_p7 }
  0x3a   : > { %1598 = shalt.err (!%p1595_p6)
}
  0x3b   : > { %1425 = dma.hbm_to_vmem [thread:$0]  (!%p1898_p12), %s2109_s2, 16, %s378_s22, [#allocation3]  }
  0x3c   : > { %s1760_s16 = smov [#allocation7]   ;;  %s1761_s18 = smov [#allocation10]  }
  0x3d   : > { %s401_s20 = sshll.u32 %s1760_s16, 4  ;;  %s425_s21 = sshll.u32 %s1761_s18, 4  ;;  %s402_s20 = int_to_ptr.vmem [resolvable:$true] %s401_s20  ;;  %s426_s21 = int_to_ptr.vmem [resolvable:$true] %s425_s21 }
  0x3e   : > { %s1610_s26 = scalar_lea.vmem %s402_s20, 16  ;;  %s1617_s19 = scalar_lea.vmem %s402_s20, 32 }
  0x3f   : > { %p1611_p5 = scmp.ne.s32.totalorder %s402_s20, %s1610_s26  ;;  %p1618_p3 = scmp.lt.s32.totalorder %s402_s20, %s402_s20 }
  0x40   : > { %p1619_p2 = scmp.lt.s32.totalorder %s1617_s19, %s1610_s26 }
  0x41   : > { %p1613_p0 = pnand %p1611_p5, %p1904_p13 }
  0x42   : > { %p1620_p4 = por %p1619_p2, %p1618_p3 }
  0x43   : > { %p1614_p1 = pneg %p1613_p0 }
  0x45   : > { %p1621_p7 = pnand %p1620_p4, %p1614_p1 }
  0x47   : > { %1624 = shalt.err (!%p1621_p7)
}
  0x48   : > { %1431 = dma.hbm_to_vmem [thread:$0]  (!%p1898_p12), %s2111_s4, 16, %s402_s20, [#allocation6]  }
  0x49   : > { %s1636_s29 = scalar_lea.vmem %s426_s21, 16  ;;  %s1643_s27 = scalar_lea.vmem %s426_s21, 32 }
  0x4a   : > { %p1637_p9 = scmp.ne.s32.totalorder %s426_s21, %s1636_s29  ;;  %p1644_p6 = scmp.lt.s32.totalorder %s426_s21, %s426_s21 }
  0x4b   : > { %p1645_p5 = scmp.lt.s32.totalorder %s1643_s27, %s1636_s29 }
  0x4c   : > { %p1639_p8 = pnand %p1637_p9, %p1904_p13 }
  0x4d   : > { %p1646_p0 = por %p1645_p5, %p1644_p6 }
  0x4e   : > { %p1640_p11 = pneg %p1639_p8 }
  0x50   : > { %p1647_p3 = pnand %p1646_p0, %p1640_p11 }
  0x52   : > { %1650 = shalt.err (!%p1647_p3)
}
  0x53   : > { %1437 = dma.hbm_to_vmem [thread:$0]  (!%p1898_p12), %s2113_s6, 16, %s426_s21, [#allocation9]  }
  0x54   : > { %s1762_s20 = smov [#allocation11]  }
  0x55   : > { %s439_s26 = sshll.u32 %s1762_s20, 4  ;;  %s440_s26 = int_to_ptr.vmem [resolvable:$true] %s439_s26 }
  0x56   : > { %s1662_s19 = scalar_lea.vmem %s440_s26, 16  ;;  %s1669_s24 = scalar_lea.vmem %s440_s26, 32 }
  0x57   : > { %p1663_p1 = scmp.ne.s32.totalorder %s440_s26, %s1662_s19  ;;  %p1670_p7 = scmp.lt.s32.totalorder %s440_s26, %s440_s26 }
  0x58   : > { %p1671_p9 = scmp.lt.s32.totalorder %s1669_s24, %s1662_s19 }
  0x59   : > { %p1665_p2 = pnand %p1663_p1, %p1904_p13 }
  0x5a   : > { %p1672_p8 = por %p1671_p9, %p1670_p7 }
  0x5b   : > { %p1666_p4 = pneg %p1665_p2 }
  0x5d   : > { %p1673_p11 = pnand %p1672_p8, %p1666_p4 }
  0x5f   : > { %1676 = shalt.err (!%p1673_p11)
}
  0x60   : > { %1440 = dma.hbm_to_vmem [thread:$0]  (!%p1898_p12), %s2115_s8, 16, %s440_s26, [#allocation12]  }
  0x61   : > { %474 = sbr.rel (%p1890_p10) target bundleno = 1667 (0x683), region = 76  ;;  %p2141_p6 = scmp.eq.s32.totalorder (!%p1890_p10), %s1862_s17, 0 }
  0x66   : > { %1720 = dma.done.wait (%p2141_p6), [#allocation3], 16   ;;  %p2142_p13 = pmov %p2141_p6 }
  0x67   : > { %p2143_p5 = pmov %p2141_p6 }
  0x68   : > { %1722 = vsyncadd (%p2142_p13), [#allocation3], 4294967280 }
  0x69   : > { %1724 = dma.done.wait (%p2143_p5), [#allocation6], 272   ;;  %p2144_p0 = pmov %p2143_p5 }
  0x6b   : > { %1726 = vsyncadd (%p2144_p0), [#allocation6], 4294967024  ;;  %p2145_p3 = pmov %p2144_p0 }
  0x6c   : > { %p2146_p12 = pmov %p2144_p0 }
  0x6d   : > { %1728 = dma.done.wait (%p2145_p3), [#allocation9], 272  }
  0x6e   : > { %1730 = vsyncadd (%p2146_p12), [#allocation9], 4294967024  ;;  %p2147_p10 = pmov %p2144_p0 }
  0x6f   : > { %p2148_p1 = pmov %p2144_p0 }
  0x70   : > { %1732 = dma.done.wait (%p2147_p10), [#allocation12], 16  }
  0x71   : > { %1734 = vsyncadd (%p2148_p1), [#allocation12], 4294967280  ;;  %p539_p2 = scmp.lt.s32.totalorder %s1862_s17, 1  ;;  %v1763_v0 = vmov 0.0   ;;  %vm1764_vm0 = vmmov 0   ;;  %v1501_v1 = vld [vmem:[%s2108_s1 + $0x8] sm:$0xff]  }
  0x72   : > { %1336 = vmatprep.subr.bf16.mxu0 %v1763_v0  ;;  %1340 = vmatprep.mubr.msk.bf16.mxu0 %vm1764_vm0, %v1763_v0  ;;  %v1502_v2 = vld [vmem:[%s2108_s1] sm:$0xff]   ;;  %v1503_v4 = vld [vmem:[#allocation5 + $0x8] sm:$0xff]   ;;  %vm569_vm1 = vcmask 261120   ;;  %v1508_v10 = vld [vmem:[#allocation8] sm:$0xff]   ;;  %vm850_vm2 = vcmask 1043456   ;;  %vm809_vm3 = vcmask 31744  }
  0x73   : > { %s540_s15 = scalar_select %p539_p2, %s1862_s17, 1  ;;  %1344 = vmatprep.subr.bf16.mxu1 %v1763_v0  ;;  %1348 = vmatprep.mubr.msk.bf16.mxu1 %vm1764_vm0, %v1763_v0  ;;  %v1504_v6 = vld [vmem:[#allocation5] sm:$0xff]   ;;  %v1284_v11 = vld [vmem:[#allocation2] ss:$0 sm:$0xff]  ;;  %vm846_vm4 = vcmask 64512   ;;  %vm894_vm5 = vcmask 257024  }
  0x74   : > { %1337 = vmatpush3.bf16.msra.mxu0 %v1501_v1  ;;  %1345 = vmatpush3.bf16.msra.mxu1 %v1503_v4  ;;  %v1506_v7 = vld [vmem:[#allocation8 + $0x8] sm:$0xff]   ;;  %v1505_v8 = vld [vmem:[%s2114_s7 + $0x8] sm:$0xff]   ;;  %v1296_v23 = vld [vmem:[#allocation11] ss:$0 sm:$0xff]  ;;  %s536_s29 = sand.u32 1, %s1745_s30   ;;  %s1311_s21 = sshll.u32 %s1862_s17, 7 }
  0x75   : > { %s1283_s25 = sshll.u32 %s540_s15, 3  ;;  %1338 = vmatprep.subr.bf16.mxu0 %v1763_v0  ;;  %1346 = vmatprep.subr.bf16.mxu1 %v1763_v0  ;;  %v1507_v9 = vld [vmem:[%s2114_s7] sm:$0xff]   ;;  %v1509_v54 = vld [vmem:[%s2116_s9 + $0x8] sm:$0xff]   ;;  %s1282_s15 = sshll.u32 %s536_s29, 3 }
  0x76   : > { %s542_s27 = scalar_lea.vmem %s2107_s0, %s1283_s25  ;;  %v1510_v55 = vld [vmem:[%s2116_s9] sm:$0xff]   ;;  %s2065_s26 = scalar_lea.hbm %s2121_s14, %s1311_s21 }
  0x77   : > { %v544_v3 = vld [vmem:[%s542_s27] sm:$0xff]  ;;  %s538_s27 = scalar_lea.vmem [#allocation13], %s1282_s15  ;;  %s1134_s17 = scalar_lea.sflag [#allocation4], %s536_s29 }
  0x78   : > { %v545_v5 = vpack.c.bf16 %v544_v3, %v544_v3  ;;  %1339 = vmatpush3.bf16.msra.mxu0 %v1502_v2  ;;  %1347 = vmatpush3.bf16.msra.mxu1 %v1504_v6  ;;  %v742_v56 = vld [vmem:[%s2120_s13] sm:$0xf]  ;;  %v1292_v60 = vld [vmem:[#allocation10] ss:$0 sm:$0xff]  ;;  %s1147_s16 = sshll.u32 %s538_s27, 4  ;;  %p2149_p7 = scmp.ne.s32.totalorder %s2135_s23, 0  ;;  %s2067_s16 = int_to_ptr.vmem [resolvable:$true] %s1147_s16 }
  0x79   : > { %1352 = vmatprep.subr.bf16.mxu0 %v1763_v0  ;;  %1360 = vmatprep.subr.bf16.mxu1 %v1763_v0  ;;  %s1677_s19 = scalar_lea.vmem %s2067_s16, 128  ;;  %s1765_s24 = smov [#allocation13]  }
  0x7a   : > { %p1678_p4 = scmp.ne.s32.totalorder %s2067_s16, %s1677_s19  ;;  %s1681_s22 = sshll.u32 %s1765_s24, 4  ;;  %s1682_s22 = int_to_ptr.vmem [resolvable:$false] %s1681_s22 }
  0x7b   : > { %1341 = vmatmul.mubr.msk.bf16.vlgmr.msra.gmra.mxu0 %vm569_vm1, %v545_v5  ;;  %1349 = vmatmul.mubr.msk.bf16.vlgmr.msra.gmra.mxu1 %vm569_vm1, %v545_v5  ;;  %s1683_s15 = scalar_lea.vmem %s1682_s22, 256  ;;  %p1684_p11 = scmp.lt.s32.totalorder %s2067_s16, %s1682_s22 }
  0x7c   : > { %1353 = vmatpush3.bf16.msra.mxu0 %v1506_v7  ;;  %1356 = vmatprep.mubr.msk.bf16.mxu0 %vm1764_vm0, %v1763_v0  ;;  %p1679_p9 = pnand %p1678_p4, %p2149_p7  ;;  %p1685_p6 = scmp.lt.s32.totalorder %s1683_s15, %s1677_s19 }
  0x7d   : > { %1354 = vmatprep.subr.bf16.mxu0 %v1763_v0  ;;  %1361 = vmatpush3.bf16.msra.mxu1 %v1505_v8 }
  0x7e   : > { %1364 = vmatprep.mubr.msk.bf16.mxu1 %vm1764_vm0, %v1763_v0  ;;  %1362 = vmatprep.subr.bf16.mxu1 %v1763_v0  ;;  %p1680_p8 = pneg %p1679_p9  ;;  %p1686_p13 = por %p1685_p6, %p1684_p11 }
  0x80   : > { %1355 = vmatpush3.bf16.msra.mxu0 %v1508_v10  ;;  %p1687_p5 = pnand %p1686_p13, %p1680_p8 }
  0x81   : > { %1363 = vmatpush3.bf16.msra.mxu1 %v1507_v9  ;;  %1368 = vmatprep.subr.bf16.mxu0 %v1763_v0 }
  0x82   : > { %1374 = vmatprep.subr.bf16.mxu1 %v1763_v0 }
  0x83   : > { %1357 = vmatmul.mubr.msk.bf16.vlgmr.msra.gmra.mxu0 %vm569_vm1, %v545_v5 }
  0x84   : > { %1370 = vmatprep.mubr.msk.bf16.mxu0 %vm1764_vm0, %v1763_v0 }
 0x13b   : > { %v607_v12 = vpop.f32.mrf.mxu0  ;;  %v2010_v16 = vpop.f32.mrf.mxu1 }
 0x13c   : > { %v608_v13 = vadd.f32 %v1284_v11, %v607_v12 }
 0x13d   : > { %v1342_v14 = vpop.f32.mrf.mxu0  ;;  %v1350_v19 = vpop.f32.mrf.mxu1 }
 0x13e   : > { %v2008_v15 = vpack.c.bf16 %v608_v13, %v608_v13  ;;  %v1301_v13 = vld [vmem:[%s2117_s10] ss:$0 sm:$0xff] }
 0x13f   : > { %v610_v17 = vpop.f32.mrf.mxu0  ;;  %v674_v21 = vpop.f32.mrf.mxu1 }
 0x140   : > { %1365 = vmatmul.mubr.msk.bf16.vlgmr.msra.gmra.mxu1 %vm569_vm1, %v2008_v15  ;;  %v851_v18 = vsel %vm850_vm2, %v2008_v15, 0 }
 0x141   : > { %v1343_v20 = vpop.f32.mrf.mxu0  ;;  %1369 = vmatpush3.bf16.msra.mxu0 %v851_v18  ;;  %1378 = vmatprep.mubr.msk.bf16.mxu1 %vm1764_vm0, %v1763_v0  ;;  %v1351_v22 = vpop.f32.mrf.mxu1 }
 0x142   : > { %1382 = vmatprep.subr.bf16.mxu0 %v1763_v0  ;;  %1375 = vmatpush3.bf16.msra.mxu1 %v1509_v54 }
 0x143   : > { %v735_v41 = vpop.f32.mrf.mxu0  ;;  %1376 = vmatprep.subr.bf16.mxu1 %v1763_v0 }
 0x144   : > { %v736_v1 = vadd.f32 %v1292_v60, %v735_v41 }
 0x145   : > { %v1358_v43 = vpop.f32.mrf.mxu0 }
 0x146   : > { %1377 = vmatpush3.bf16.msra.mxu1 %v1510_v55  ;;  %v741_v5 = vpack.c.bf16 %v736_v1, %v736_v1  ;;  %v1512_v43 = vld [vmem:[%s2118_s11] sm:$0xff]  }
 0x147   : > { %v738_v45 = vpop.f32.mrf.mxu0  ;;  %1388 = vmatprep.subr.bf16.mxu1 %v1763_v0 }
 0x148   : > { %v902_v8 = vunpack.c.l.bf16 %v741_v5 }
 0x149   : > { %v1359_v47 = vpop.f32.mrf.mxu0 }
 0x14a   : > { %v1288_v47 = vld [vmem:[#allocation7] ss:$0 sm:$0xff] }
 0x200   : > { %v803_v24 = vpop.f32.mrf.mxu1 }
 0x201   : > { %v804_v25 = vadd.f32 %v1296_v23, %v803_v24 }
 0x202   : > { %v1366_v26 = vpop.f32.mrf.mxu1 }
 0x203   : > { %v810_v27 = vsel %vm809_vm3, %v804_v25, -inf }
 0x204   : > { %v811_v28 = vrot.slane %v810_v27, 4  ;;  %v806_v29 = vpop.f32.mrf.mxu1 }
 0x206   : > { %v812_v30 = vmax.f32 %v810_v27, %v811_v28  ;;  %v1367_v31 = vpop.f32.mrf.mxu1 }
 0x208   : > { %v813_v32 = vrot.slane %v812_v30, 2 }
 0x20a   : > { %v814_v33 = vmax.f32 %v812_v30, %v813_v32 }
 0x20c   : > { %v815_v34 = vrot.slane %v814_v33, 1 }
 0x20e   : > { %v816_v35 = vmax.f32 %v814_v33, %v815_v34 }
 0x210   : > { %v817_v36 = vsub.f32 %v804_v25, %v816_v35 }
 0x212   : > { %v818_v37 = vmul.f32 1.442695, %v817_v36 }
 0x214   : > { %1513 = vpow2.f32 %v818_v37 }
 0x221   : > { %v1514_v38 = vpop.eup %1513 }
 0x222   : > { %v820_v39 = vsel %vm809_vm3, %v1514_v38, 0.0 }
 0x223   : > { %v821_v40 = vrot.slane %v820_v39, 4 }
 0x225   : > { %v822_v42 = vadd.f32 %v821_v40, %v820_v39 }
 0x227   : > { %v823_v44 = vrot.slane %v822_v42, 2 }
 0x229   : > { %v824_v46 = vadd.f32 %v823_v44, %v822_v42  ;;  %v1511_v42 = vld [vmem:[%s2118_s11 + $0x8] sm:$0xff]  }
 0x22b   : > { %v825_v48 = vrot.slane %v824_v46, 1 }
 0x22d   : > { %v826_v49 = vadd.f32 %v825_v48, %v824_v46 }
 0x22f   : > { %1515 = vrcp.f32 %v826_v49 }
 0x23c   : > { %v1516_v50 = vpop.eup %1515 }
 0x23d   : > { %v828_v51 = vmul.f32 %v1516_v50, %v1514_v38 }
 0x23f   : > { %v829_v52 = vpack.c.bf16 %v828_v51, %v828_v51  ;;  %v672_v51 = vadd.f32 %v1288_v47, %v2010_v16  ;;  %v1309_v16 = vld [vmem:[%s2119_s12] ss:$0 sm:$0xff] }
 0x241   : > { %830 = vxpose.xlu0.c.b16.start.end [1/1] (short) (narrow) %v829_v52, 16  ;;  %v677_v54 = vpack.c.bf16 %v672_v51, %v672_v51 }
 0x2a3   : > { %v838_v53 = vpop.trf.xlu0 }
 0x2a4   : > { %1371 = vmatmul.mubr.msk.bf16.vlgmr.msra.gmra.mxu0 %vm846_vm4, %v838_v53 }
 0x2a5   : > { %1384 = vmatprep.mubr.msk.bf16.mxu0 %vm1764_vm0, %v1763_v0 }
 0x364   : > { %v887_v57 = vpop.f32.mrf.mxu0 }
 0x365   : > { %v893_v58 = vmul.f32 %v887_v57, %v742_v56 }
 0x366   : > { %v1372_v59 = vpop.f32.mrf.mxu0 }
 0x367   : > { %v895_v61 = vsel %vm894_vm5, %v893_v58, 0.0  ;;  %v1060_v58 = vunpack.c.l.bf16 %v677_v54 }
 0x368   : > { %v896_v62 = vrot.slane %v895_v61, 4  ;;  %v890_v63 = vpop.f32.mrf.mxu0 }
 0x36a   : > { %v897_v2 = vadd.f32 %v896_v62, %v895_v61  ;;  %v1373_v3 = vpop.f32.mrf.mxu0  ;;  %v1063_v61 = vunpack.c.l.bf16 %v2008_v15 }
 0x36c   : > { %v898_v4 = vrot.slane %v897_v2, 2 }
 0x36e   : > { %v899_v6 = vadd.f32 %v898_v4, %v897_v2 }
 0x370   : > { %v900_v7 = vrot.slane %v899_v6, 1 }
 0x372   : > { %v901_v9 = vadd.f32 %v900_v7, %v899_v6 }
 0x374   : > { %v903_v10 = vmul.f32 %v902_v8, %v901_v9 }
 0x376   : > { %v904_v11 = vpack.c.bf16 %v903_v10, %v903_v10 }
 0x378   : > { %1379 = vmatmul.mubr.msk.bf16.vlgmr.msra.gmra.mxu1 %vm569_vm1, %v904_v11  ;;  %v1010_v12 = vsel %vm850_vm2, %v904_v11, 0 }
 0x379   : > { %1383 = vmatpush3.bf16.msra.mxu0 %v1010_v12  ;;  %1392 = vmatprep.mubr.msk.bf16.mxu1 %vm1764_vm0, %v1763_v0 }
 0x37a   : > { %1389 = vmatpush3.bf16.msra.mxu1 %v1511_v42 }
 0x37b   : > { %1390 = vmatprep.subr.bf16.mxu1 %v1763_v0 }
 0x37e   : > { %1391 = vmatpush3.bf16.msra.mxu1 %v1512_v43 }
 0x438   : > { %v965_v14 = vpop.f32.mrf.mxu1 }
 0x439   : > { %v966_v17 = vadd.f32 %v1301_v13, %v965_v14 }
 0x43a   : > { %v1380_v18 = vpop.f32.mrf.mxu1 }
 0x43b   : > { %v971_v19 = vsel %vm809_vm3, %v966_v17, -inf }
 0x43c   : > { %v972_v20 = vrot.slane %v971_v19, 4  ;;  %v968_v21 = vpop.f32.mrf.mxu1 }
 0x43e   : > { %v973_v22 = vmax.f32 %v971_v19, %v972_v20  ;;  %v1381_v23 = vpop.f32.mrf.mxu1 }
 0x440   : > { %v974_v24 = vrot.slane %v973_v22, 2 }
 0x442   : > { %v975_v25 = vmax.f32 %v973_v22, %v974_v24 }
 0x444   : > { %v976_v26 = vrot.slane %v975_v25, 1 }
 0x446   : > { %v977_v27 = vmax.f32 %v975_v25, %v976_v26 }
 0x448   : > { %v978_v28 = vsub.f32 %v966_v17, %v977_v27 }
 0x44a   : > { %v979_v29 = vmul.f32 1.442695, %v978_v28 }
 0x44c   : > { %1517 = vpow2.f32 %v979_v29 }
 0x459   : > { %v1518_v30 = vpop.eup %1517 }
 0x45a   : > { %v981_v31 = vsel %vm809_vm3, %v1518_v30, 0.0 }
 0x45b   : > { %v982_v32 = vrot.slane %v981_v31, 4 }
 0x45d   : > { %v983_v33 = vadd.f32 %v982_v32, %v981_v31 }
 0x45f   : > { %v984_v34 = vrot.slane %v983_v33, 2 }
 0x461   : > { %v985_v35 = vadd.f32 %v984_v34, %v983_v33 }
 0x463   : > { %v986_v36 = vrot.slane %v985_v35, 1 }
 0x465   : > { %v987_v37 = vadd.f32 %v986_v36, %v985_v35 }
 0x467   : > { %1519 = vrcp.f32 %v987_v37 }
 0x474   : > { %v1520_v38 = vpop.eup %1519 }
 0x475   : > { %v989_v39 = vmul.f32 %v1520_v38, %v1518_v30 }
 0x477   : > { %v990_v40 = vpack.c.bf16 %v989_v39, %v989_v39 }
 0x479   : > { %991 = vxpose.xlu0.c.b16.start.end [1/1] (short) (narrow) %v990_v40, 16 }
 0x4db   : > { %v999_v41 = vpop.trf.xlu0 }
 0x4dc   : > { %1385 = vmatmul.mubr.msk.bf16.vlgmr.msra.gmra.mxu0 %vm846_vm4, %v999_v41 }
 0x59c   : > { %v1046_v44 = vpop.f32.mrf.mxu0 }
 0x59d   : > { %v1052_v45 = vmul.f32 %v1046_v44, %v742_v56 }
 0x59e   : > { %v1386_v46 = vpop.f32.mrf.mxu0 }
 0x59f   : > { %v1053_v48 = vsel %vm894_vm5, %v1052_v45, 0.0 }
 0x5a0   : > { %v1054_v49 = vrot.slane %v1053_v48, 4  ;;  %v1049_v50 = vpop.f32.mrf.mxu0 }
 0x5a2   : > { %v1055_v52 = vadd.f32 %v1054_v49, %v1053_v48  ;;  %v1387_v53 = vpop.f32.mrf.mxu0 }
 0x5a4   : > { %v1056_v0 = vrot.slane %v1055_v52, 2 }
 0x5a6   : > { %v1057_v55 = vadd.f32 %v1056_v0, %v1055_v52 }
 0x5a8   : > { %v1058_v57 = vrot.slane %v1057_v55, 1 }
 0x5aa   : > { %v1059_v59 = vadd.f32 %v1058_v57, %v1057_v55 }
 0x5ac   : > { %v1061_v60 = vmul.f32 %v1060_v58, %v1059_v59 }
 0x5ae   : > { %v1062_v56 = vpack.c.bf16 %v1061_v60, %v1061_v60 }
 0x5b0   : > { %1393 = vmatmul.mubr.msk.bf16.vlgmr.msra.gmra.mxu1 %vm569_vm1, %v1062_v56 }
 0x670   : > { %v1117_v62 = vpop.f32.mrf.mxu1 }
 0x671   : > { %v1123_v63 = vadd.f32 %v1117_v62, %v1063_v61 }
 0x672   : > { %v1394_v1 = vpop.f32.mrf.mxu1 }
 0x673   : > { %v1131_v2 = vadd.f32 %v1309_v16, %v1123_v63 }
 0x674   : > { %v1120_v15 = vpop.f32.mrf.mxu1 }
 0x675   : > { %1132 = vst.msk [vmem:[%s538_s27] sm:$0xff] %vm569_vm1, %v1131_v2 }
 0x676   : > { %v1395_v3 = vpop.f32.mrf.mxu1 }
 0x677   : > { %1690 = shalt.err (!%p1687_p5)
}
 0x678   : > { %s1691_s25 = scalar_lea.hbm %s2065_s26, 128  ;;  %s1695_s21 = scalar_lea.hbm %s2121_s14, 256 }
 0x679   : > { %p1692_p0 = scmp.ne.s32.totalorder %s2065_s26, %s1691_s25  ;;  %p1696_p10 = scmp.lt.s32.totalorder %s2065_s26, %s2121_s14 }
 0x67a   : > { %p1697_p1 = scmp.lt.s32.totalorder %s1695_s21, %s1691_s25 }
 0x67b   : > { %p1693_p3 = pnand %p1692_p0, %p2149_p7 }
 0x67c   : > { %p1698_p2 = por %p1697_p1, %p1696_p10 }
 0x67d   : > { %p1694_p12 = pneg %p1693_p3 }
 0x67f   : > { %p1699_p4 = pnand %p1698_p2, %p1694_p12 }
 0x681   : > { %1702 = shalt.err (!%p1699_p4)
}
 0x682   : > { %1420 = dma.vmem_to_hbm [thread:$0]  (%p2149_p7), %s2067_s16, 128, %s2065_s26, %s1134_s17  }
 0x683 PF: > { %s2150_s20 = sld [smem:[#allocation21_spill]] }
 0x684   : > { %s2151_s19 = sld [smem:[#allocation19_spill]] }
 0x685   : > { %s2152_s24 = sld [smem:[#allocation24_spill]] }
 0x689   : > { %p1457_p9 = scmp.ge.s32.totalorder %s2150_s20, 2 }
 0x68a   : > { %s1159_s22 = sand.u32 1, %s2151_s19  }
 0x68b   : > { %p2153_p8 = scmp.ne.s32.totalorder %s2152_s24, 0  ;;  %s1160_s15 = scalar_lea.sflag [#allocation4], %s1159_s22 }
 0x68d   : > { %p1442_p11 = pnand %p1457_p9, %p2153_p8 }
 0x68f   : > { %p1443_p6 = pneg %p1442_p11 }
 0x691   : > { %1736 = dma.done.wait (%p1443_p6), %s1160_s15, 128  }
 0x692   : > { %1738 = vsyncadd (%p1443_p6), %s1160_s15, 4294967168  ;;  %s2154_s16 = sld [smem:[#allocation22_spill]]  ;;  %s2157_s29 = smov %s1745_s30 }
 0x693   : > { %s2155_s25 = sld [smem:[#allocation20_spill]] }
 0x694   : > { %s2156_s15 = sld [smem:[#allocation23_spill]] }
 0x698   : > { %p28_p13 = scmp.ge.s32.totalorder %s2154_s16, 4  }
 0x699   : > { %s2158_s30 = smov %s2155_s25 }
 0x69a   :  { %30 = sbr.rel (!%p28_p13) target bundleno = 7 (0x7), region = 136 }
 0x69f   :  { %1165 = vsyncpa [#allocation3], 1 }
 0x6a0   :  { %1167 = vsyncpa [#allocation3 + $0x1], 1 }
 0x6a1   :  { %1168 = vsyncpa [#allocation6], 1 }
 0x6a2   :  { %1169 = vsyncpa [#allocation9], 1 }
 0x6a3   :  { %1170 = vsyncpa [#allocation12], 1 }
 0x6a4   :  { %1171 = vsyncpa [#allocation4], 1 }
 0x6a5   :  { %1173 = vsyncpa [#allocation4 + $0x1], 1 }

// kernel: tpu_custom_call.1
= control target key start
LH: loop header
LB: loop body
LE: loop exit
PB: predicated region body
PF: predicated region fallthrough
CT: control target
= control target key end

     0   :  { %19 = vsyncpa [#allocation3], 0  ;;  %s2107_s0 = inlined_call_operand.vmem [shape: f32[16,32], index: 0, kind: input, shape index: {}]   ;;  %s2108_s1 = inlined_call_operand.vmem [shape: bf16[32,32], index: 1, kind: input, shape index: {}]   ;;  %s2109_s2 = inlined_call_operand.hbm [shape: f32[1,32], index: 2, kind: input, shape index: {}]   ;;  %s2110_s3 = inlined_call_operand.hbm [shape: bf16[32,32], index: 3, kind: input, shape index: {}]   ;;  %s2111_s4 = inlined_call_operand.hbm [shape: f32[1,32], index: 4, kind: input, shape index: {}]   ;;  %s2112_s5 = inlined_call_operand.hbm [shape: bf16[32,32], index: 5, kind: input, shape index: {}]   ;;  %s2113_s6 = inlined_call_operand.hbm [shape: f32[1,32], index: 6, kind: input, shape index: {}]   ;;  %s2114_s7 = inlined_call_operand.vmem [shape: bf16[32,4], index: 7, kind: input, shape index: {}]   ;;  %s2115_s8 = inlined_call_operand.hbm [shape: f32[1,4], index: 8, kind: input, shape index: {}]   ;;  %s2116_s9 = inlined_call_operand.vmem [shape: bf16[32,4], index: 9, kind: input, shape index: {}]   ;;  %s2117_s10 = inlined_call_operand.vmem [shape: f32[1,4], index: 10, kind: input, shape index: {}]   ;;  %s2118_s11 = inlined_call_operand.vmem [shape: bf16[32,32], index: 11, kind: input, shape index: {}]   ;;  %s2119_s12 = inlined_call_operand.vmem [shape: f32[1,32], index: 12, kind: input, shape index: {}]   ;;  %s2120_s13 = inlined_call_operand.vmem [shape: f32[4,32], index: 13, kind: input, shape index: {}]   ;;  %s2121_s14 = inlined_call_operand.hbm [shape: f32[16,32], index: 14, kind: output, shape index: {}]  }
   0x1   :  { %20 = vsyncpa [#allocation6], 0 }
   0x2   :  { %21 = vsyncpa [#allocation9], 0 }
   0x3   :  { %22 = vsyncpa [#allocation12], 0 }
   0x4   :  { %23 = vsyncpa [#allocation4], 0 }
   0x5   :  { %25 = vsyncpa [#allocation4 + $0x1], 0  ;;  %s1841_s29 = smov 0   ;;  %s1843_s30 = smov 0  }
   0x6   :  { %s1845_s15 = smov 0   ;;  %s1847_s16 = smov 0  }
   0x7 LB: > { %2130 = sst [smem:[#allocation19_spill]] %s1741_s29  ;;  %s1862_s17 = sadd.s32 4294967295, %s1753_s16   ;;  %s1753_s16 = sphi %s1847_s16, %s2154_s16   ;;  %s1749_s15 = sphi %s1845_s15, %s2156_s15   ;;  %s1745_s30 = sphi %s1843_s30, %s2158_s30   ;;  %s1741_s29 = sphi %s1841_s29, %s2157_s29  }
   0x8   : > { %2131 = sst [smem:[#allocation20_spill]] %s1749_s15  ;;  %s1266_s18 = sadd.s32 4294967294, %s1753_s16  }
   0x9   : > { %2132 = sst [smem:[#allocation21_spill]] %s1753_s16  ;;  %s1866_s19 = sadd.s32 1, %s1753_s16  }
   0xa   : > { %2133 = sst [smem:[#allocation22_spill]] %s1866_s19  ;;  %s337_s20 = sadd.s32 1, %s1749_s15 }
   0xb   : > { %s334_s21 = ssub.s32 %s1753_s16, %s1866_s19  ;;  %p347_p0 = scmp.ne.s32.totalorder %s1749_s15, %s1745_s30 }
   0xc   : > { %p335_p1 = scmp.eq.s32.totalorder %s334_s21, 0  ;;  %p348_p2 = scmp.eq.s32.totalorder %s1862_s17, 1 }
   0xd   : > { %p353_p3 = scmp.ne.s32.totalorder %s1745_s30, %s1741_s29  ;;  %p354_p4 = scmp.eq.s32.totalorder %s1266_s18, 1 }
   0xe   : > { %s1877_s22 = scalar_select %p335_p1, %s1749_s15, %s337_s20  }
   0xf   : > { %p1879_p5 = por %p348_p2, %p347_p0  ;;  %p1883_p6 = por %p354_p4, %p353_p3 }
  0x10   : > { %2134 = sst [smem:[#allocation23_spill]] %s1877_s22  ;;  %p1267_p7 = scmp.ge.s32.totalorder %s1753_s16, 1 }
  0x11   : > { %s2135_s23 = scalar_select %p1879_p5, 1, 0 }
  0x12   : > { %s2136_s24 = scalar_select %p1883_p6, 1, 0 }
  0x13   : > { %p361_p8 = scmp.lt.s32.totalorder %s1753_s16, 3  ;;  %p2127_p9 = scmp.eq.s32.totalorder %s1862_s17, 0 }
  0x14   : > { %2137 = sst [smem:[#allocation24_spill]] %s2136_s24  ;;  %s1755_s26 = smov [#allocation5]  }
  0x15   : > { %p1890_p10 = pnand %p1267_p7, %p361_p8  ;;  %s387_s27 = sshll.u32 %s1755_s26, 4  ;;  %s388_s27 = int_to_ptr.vmem [resolvable:$true] %s387_s27 }
  0x16   : > { %s1756_s18 = smov [#allocation8]   ;;  %s1757_s21 = smov [#allocation2]  }
  0x17   : > { %p1422_p11 = pneg %p1890_p10  ;;  %s411_s20 = sshll.u32 %s1756_s18, 4  ;;  %s412_s20 = int_to_ptr.vmem [resolvable:$true] %s411_s20 }
  0x18   : > { %s377_s22 = sshll.u32 %s1757_s21, 4  ;;  %s1532_s26 = scalar_lea.vmem %s388_s27, 256  ;;  %s378_s22 = int_to_ptr.vmem [resolvable:$true] %s377_s22 }
  0x19   : > { %p1898_p12 = pnand %p2127_p9, %p1422_p11  ;;  %p1533_p0 = scmp.ne.s32.totalorder %s388_s27, %s1532_s26 }
  0x1a   : > { %p1540_p3 = scmp.lt.s32.totalorder %s388_s27, %s388_s27  ;;  %p1541_p4 = scmp.lt.s32.totalorder %s1532_s26, %s1532_s26 }
  0x1b   : > { %p1904_p13 = pneg %p1898_p12 }
  0x1c   : > { %p1542_p7 = por %p1541_p4, %p1540_p3 }
  0x1d   : > { %p1535_p1 = pnand %p1533_p0, %p1904_p13 }
  0x1f   : > { %p1536_p2 = pneg %p1535_p1 }
  0x21   : > { %p1543_p8 = pnand %p1542_p7, %p1536_p2 }
  0x23   : > { %1546 = shalt.err (!%p1543_p8)
}
  0x24   : > { %s1758_s18 = smov 64   ;;  %s1759_s21 = smov 4  }
  0x25   : > { %1428 = dma.hbm_to_vmem [thread:$0]  (!%p1898_p12), %s2110_s3, 256, %s388_s27, [#allocation6], %s1758_s18, %s1758_s18, %s1759_s21  }
  0x26   : > { %s1558_s29 = scalar_lea.vmem %s412_s20, 256  ;;  %p1566_p1 = scmp.lt.s32.totalorder %s412_s20, %s412_s20 }
  0x27   : > { %p1559_p11 = scmp.ne.s32.totalorder %s412_s20, %s1558_s29  ;;  %p1567_p6 = scmp.lt.s32.totalorder %s1558_s29, %s1558_s29 }
  0x29   : > { %p1561_p9 = pnand %p1559_p11, %p1904_p13  ;;  %p1568_p5 = por %p1567_p6, %p1566_p1 }
  0x2b   : > { %p1562_p0 = pneg %p1561_p9 }
  0x2d   : > { %p1569_p3 = pnand %p1568_p5, %p1562_p0 }
  0x2f   : > { %1572 = shalt.err (!%p1569_p3)
}
  0x30   : > { %1434 = dma.hbm_to_vmem [thread:$0]  (!%p1898_p12), %s2112_s5, 256, %s412_s20, [#allocation9], %s1758_s18, %s1758_s18, %s1759_s21  }
  0x31   : > { %s1584_s19 = scalar_lea.vmem %s378_s22, 16  ;;  %s1591_s24 = scalar_lea.vmem %s378_s22, 32 }
  0x32   : > { %p1585_p2 = scmp.ne.s32.totalorder %s378_s22, %s1584_s19  ;;  %p1592_p9 = scmp.lt.s32.totalorder %s378_s22, %s378_s22 }
  0x33   : > { %p1593_p8 = scmp.lt.s32.totalorder %s1591_s24, %s1584_s19 }
  0x34   : > { %p1587_p4 = pnand %p1585_p2, %p1904_p13 }
  0x35   : > { %p1594_p11 = por %p1593_p8, %p1592_p9 }
  0x36   : > { %p1588_p7 = pneg %p1587_p4 }
  0x38   : > { %p1595_p6 = pnand %p1594_p11, %p1588_p7 }
  0x3a   : > { %1598 = shalt.err (!%p1595_p6)
}
  0x3b   : > { %1425 = dma.hbm_to_vmem [thread:$0]  (!%p1898_p12), %s2109_s2, 16, %s378_s22, [#allocation3]  }
  0x3c   : > { %s1760_s16 = smov [#allocation7]   ;;  %s1761_s18 = smov [#allocation10]  }
  0x3d   : > { %s401_s20 = sshll.u32 %s1760_s16, 4  ;;  %s425_s21 = sshll.u32 %s1761_s18, 4  ;;  %s402_s20 = int_to_ptr.vmem [resolvable:$true] %s401_s20  ;;  %s426_s21 = int_to_ptr.vmem [resolvable:$true] %s425_s21 }
  0x3e   : > { %s1610_s26 = scalar_lea.vmem %s402_s20, 16  ;;  %s1617_s19 = scalar_lea.vmem %s402_s20, 32 }
  0x3f   : > { %p1611_p5 = scmp.ne.s32.totalorder %s402_s20, %s1610_s26  ;;  %p1618_p3 = scmp.lt.s32.totalorder %s402_s20, %s402_s20 }
  0x40   : > { %p1619_p2 = scmp.lt.s32.totalorder %s1617_s19, %s1610_s26 }
  0x41   : > { %p1613_p0 = pnand %p1611_p5, %p1904_p13 }
  0x42   : > { %p1620_p4 = por %p1619_p2, %p1618_p3 }
  0x43   : > { %p1614_p1 = pneg %p1613_p0 }
  0x45   : > { %p1621_p7 = pnand %p1620_p4, %p1614_p1 }
  0x47   : > { %1624 = shalt.err (!%p1621_p7)
}
  0x48   : > { %1431 = dma.hbm_to_vmem [thread:$0]  (!%p1898_p12), %s2111_s4, 16, %s402_s20, [#allocation6]  }
  0x49   : > { %s1636_s29 = scalar_lea.vmem %s426_s21, 16  ;;  %s1643_s27 = scalar_lea.vmem %s426_s21, 32 }
  0x4a   : > { %p1637_p9 = scmp.ne.s32.totalorder %s426_s21, %s1636_s29  ;;  %p1644_p6 = scmp.lt.s32.totalorder %s426_s21, %s426_s21 }
  0x4b   : > { %p1645_p5 = scmp.lt.s32.totalorder %s1643_s27, %s1636_s29 }
  0x4c   : > { %p1639_p8 = pnand %p1637_p9, %p1904_p13 }
  0x4d   : > { %p1646_p0 = por %p1645_p5, %p1644_p6 }
  0x4e   : > { %p1640_p11 = pneg %p1639_p8 }
  0x50   : > { %p1647_p3 = pnand %p1646_p0, %p1640_p11 }
  0x52   : > { %1650 = shalt.err (!%p1647_p3)
}
  0x53   : > { %1437 = dma.hbm_to_vmem [thread:$0]  (!%p1898_p12), %s2113_s6, 16, %s426_s21, [#allocation9]  }
  0x54   : > { %s1762_s20 = smov [#allocation11]  }
  0x55   : > { %s439_s26 = sshll.u32 %s1762_s20, 4  ;;  %s440_s26 = int_to_ptr.vmem [resolvable:$true] %s439_s26 }
  0x56   : > { %s1662_s19 = scalar_lea.vmem %s440_s26, 16  ;;  %s1669_s24 = scalar_lea.vmem %s440_s26, 32 }
  0x57   : > { %p1663_p1 = scmp.ne.s32.totalorder %s440_s26, %s1662_s19  ;;  %p1670_p7 = scmp.lt.s32.totalorder %s440_s26, %s440_s26 }
  0x58   : > { %p1671_p9 = scmp.lt.s32.totalorder %s1669_s24, %s1662_s19 }
  0x59   : > { %p1665_p2 = pnand %p1663_p1, %p1904_p13 }
  0x5a   : > { %p1672_p8 = por %p1671_p9, %p1670_p7 }
  0x5b   : > { %p1666_p4 = pneg %p1665_p2 }
  0x5d   : > { %p1673_p11 = pnand %p1672_p8, %p1666_p4 }
  0x5f   : > { %1676 = shalt.err (!%p1673_p11)
}
  0x60   : > { %1440 = dma.hbm_to_vmem [thread:$0]  (!%p1898_p12), %s2115_s8, 16, %s440_s26, [#allocation12]  }
  0x61   : > { %474 = sbr.rel (%p1890_p10) target bundleno = 1667 (0x683), region = 76  ;;  %p2141_p6 = scmp.eq.s32.totalorder (!%p1890_p10), %s1862_s17, 0 }
  0x66   : > { %1720 = dma.done.wait (%p2141_p6), [#allocation3], 16   ;;  %p2142_p13 = pmov %p2141_p6 }
  0x67   : > { %p2143_p5 = pmov %p2141_p6 }
  0x68   : > { %1722 = vsyncadd (%p2142_p13), [#allocation3], 4294967280 }
  0x69   : > { %1724 = dma.done.wait (%p2143_p5), [#allocation6], 272   ;;  %p2144_p0 = pmov %p2143_p5 }
  0x6b   : > { %1726 = vsyncadd (%p2144_p0), [#allocation6], 4294967024  ;;  %p2145_p3 = pmov %p2144_p0 }
  0x6c   : > { %p2146_p12 = pmov %p2144_p0 }
  0x6d   : > { %1728 = dma.done.wait (%p2145_p3), [#allocation9], 272  }
  0x6e   : > { %1730 = vsyncadd (%p2146_p12), [#allocation9], 4294967024  ;;  %p2147_p10 = pmov %p2144_p0 }
  0x6f   : > { %p2148_p1 = pmov %p2144_p0 }
  0x70   : > { %1732 = dma.done.wait (%p2147_p10), [#allocation12], 16  }
  0x71   : > { %1734 = vsyncadd (%p2148_p1), [#allocation12], 4294967280  ;;  %p539_p2 = scmp.lt.s32.totalorder %s1862_s17, 1  ;;  %v1763_v0 = vmov 0.0   ;;  %vm1764_vm0 = vmmov 0   ;;  %v1501_v1 = vld [vmem:[%s2108_s1 + $0x8] sm:$0xff]  }
  0x72   : > { %1336 = vmatprep.subr.bf16.mxu0 %v1763_v0  ;;  %1340 = vmatprep.mubr.msk.bf16.mxu0 %vm1764_vm0, %v1763_v0  ;;  %v1502_v2 = vld [vmem:[%s2108_s1] sm:$0xff]   ;;  %v1503_v4 = vld [vmem:[#allocation5 + $0x8] sm:$0xff]   ;;  %vm569_vm1 = vcmask 261120   ;;  %v1508_v10 = vld [vmem:[#allocation8] sm:$0xff]   ;;  %vm850_vm2 = vcmask 1043456   ;;  %vm809_vm3 = vcmask 31744  }
  0x73   : > { %s540_s15 = scalar_select %p539_p2, %s1862_s17, 1  ;;  %1344 = vmatprep.subr.bf16.mxu1 %v1763_v0  ;;  %1348 = vmatprep.mubr.msk.bf16.mxu1 %vm1764_vm0, %v1763_v0  ;;  %v1504_v6 = vld [vmem:[#allocation5] sm:$0xff]   ;;  %v1284_v11 = vld [vmem:[#allocation2] ss:$0 sm:$0xff]  ;;  %vm846_vm4 = vcmask 64512   ;;  %vm894_vm5 = vcmask 257024  }
  0x74   : > { %1337 = vmatpush3.bf16.msra.mxu0 %v1501_v1  ;;  %1345 = vmatpush3.bf16.msra.mxu1 %v1503_v4  ;;  %v1506_v7 = vld [vmem:[#allocation8 + $0x8] sm:$0xff]   ;;  %v1505_v8 = vld [vmem:[%s2114_s7 + $0x8] sm:$0xff]   ;;  %v1296_v23 = vld [vmem:[#allocation11] ss:$0 sm:$0xff]  ;;  %s536_s29 = sand.u32 1, %s1745_s30   ;;  %s1311_s21 = sshll.u32 %s1862_s17, 7 }
  0x75   : > { %s1283_s25 = sshll.u32 %s540_s15, 3  ;;  %1338 = vmatprep.subr.bf16.mxu0 %v1763_v0  ;;  %1346 = vmatprep.subr.bf16.mxu1 %v1763_v0  ;;  %v1507_v9 = vld [vmem:[%s2114_s7] sm:$0xff]   ;;  %v1509_v54 = vld [vmem:[%s2116_s9 + $0x8] sm:$0xff]   ;;  %s1282_s15 = sshll.u32 %s536_s29, 3 }
  0x76   : > { %s542_s27 = scalar_lea.vmem %s2107_s0, %s1283_s25  ;;  %v1510_v55 = vld [vmem:[%s2116_s9] sm:$0xff]   ;;  %s2065_s26 = scalar_lea.hbm %s2121_s14, %s1311_s21 }
  0x77   : > { %v544_v3 = vld [vmem:[%s542_s27] sm:$0xff]  ;;  %s538_s27 = scalar_lea.vmem [#allocation13], %s1282_s15  ;;  %s1134_s17 = scalar_lea.sflag [#allocation4], %s536_s29 }
  0x78   : > { %v545_v5 = vpack.c.bf16 %v544_v3, %v544_v3  ;;  %1339 = vmatpush3.bf16.msra.mxu0 %v1502_v2  ;;  %1347 = vmatpush3.bf16.msra.mxu1 %v1504_v6  ;;  %v742_v56 = vld [vmem:[%s2120_s13] sm:$0xf]  ;;  %v1292_v60 = vld [vmem:[#allocation10] ss:$0 sm:$0xff]  ;;  %s1147_s16 = sshll.u32 %s538_s27, 4  ;;  %p2149_p7 = scmp.ne.s32.totalorder %s2135_s23, 0  ;;  %s2067_s16 = int_to_ptr.vmem [resolvable:$true] %s1147_s16 }
  0x79   : > { %1352 = vmatprep.subr.bf16.mxu0 %v1763_v0  ;;  %1360 = vmatprep.subr.bf16.mxu1 %v1763_v0  ;;  %s1677_s19 = scalar_lea.vmem %s2067_s16, 128  ;;  %s1765_s24 = smov [#allocation13]  }
  0x7a   : > { %p1678_p4 = scmp.ne.s32.totalorder %s2067_s16, %s1677_s19  ;;  %s1681_s22 = sshll.u32 %s1765_s24, 4  ;;  %s1682_s22 = int_to_ptr.vmem [resolvable:$false] %s1681_s22 }
  0x7b   : > { %1341 = vmatmul.mubr.msk.bf16.vlgmr.msra.gmra.mxu0 %vm569_vm1, %v545_v5  ;;  %1349 = vmatmul.mubr.msk.bf16.vlgmr.msra.gmra.mxu1 %vm569_vm1, %v545_v5  ;;  %s1683_s15 = scalar_lea.vmem %s1682_s22, 256  ;;  %p1684_p11 = scmp.lt.s32.totalorder %s2067_s16, %s1682_s22 }
  0x7c   : > { %1353 = vmatpush3.bf16.msra.mxu0 %v1506_v7  ;;  %1356 = vmatprep.mubr.msk.bf16.mxu0 %vm1764_vm0, %v1763_v0  ;;  %p1679_p9 = pnand %p1678_p4, %p2149_p7  ;;  %p1685_p6 = scmp.lt.s32.totalorder %s1683_s15, %s1677_s19 }
  0x7d   : > { %1354 = vmatprep.subr.bf16.mxu0 %v1763_v0  ;;  %1361 = vmatpush3.bf16.msra.mxu1 %v1505_v8 }
  0x7e   : > { %1364 = vmatprep.mubr.msk.bf16.mxu1 %vm1764_vm0, %v1763_v0  ;;  %1362 = vmatprep.subr.bf16.mxu1 %v1763_v0  ;;  %p1680_p8 = pneg %p1679_p9  ;;  %p1686_p13 = por %p1685_p6, %p1684_p11 }
  0x80   : > { %1355 = vmatpush3.bf16.msra.mxu0 %v1508_v10  ;;  %p1687_p5 = pnand %p1686_p13, %p1680_p8 }
  0x81   : > { %1363 = vmatpush3.bf16.msra.mxu1 %v1507_v9  ;;  %1368 = vmatprep.subr.bf16.mxu0 %v1763_v0 }
  0x82   : > { %1374 = vmatprep.subr.bf16.mxu1 %v1763_v0 }
  0x83   : > { %1357 = vmatmul.mubr.msk.bf16.vlgmr.msra.gmra.mxu0 %vm569_vm1, %v545_v5 }
  0x84   : > { %1370 = vmatprep.mubr.msk.bf16.mxu0 %vm1764_vm0, %v1763_v0 }
 0x13b   : > { %v607_v12 = vpop.f32.mrf.mxu0  ;;  %v2010_v16 = vpop.f32.mrf.mxu1 }
 0x13c   : > { %v608_v13 = vadd.f32 %v1284_v11, %v607_v12 }
 0x13d   : > { %v1342_v14 = vpop.f32.mrf.mxu0  ;;  %v1350_v19 = vpop.f32.mrf.mxu1 }
 0x13e   : > { %v2008_v15 = vpack.c.bf16 %v608_v13, %v608_v13  ;;  %v1301_v13 = vld [vmem:[%s2117_s10] ss:$0 sm:$0xff] }
 0x13f   : > { %v610_v17 = vpop.f32.mrf.mxu0  ;;  %v674_v21 = vpop.f32.mrf.mxu1 }
 0x140   : > { %1365 = vmatmul.mubr.msk.bf16.vlgmr.msra.gmra.mxu1 %vm569_vm1, %v2008_v15  ;;  %v851_v18 = vsel %vm850_vm2, %v2008_v15, 0 }
 0x141   : > { %v1343_v20 = vpop.f32.mrf.mxu0  ;;  %1369 = vmatpush3.bf16.msra.mxu0 %v851_v18  ;;  %1378 = vmatprep.mubr.msk.bf16.mxu1 %vm1764_vm0, %v1763_v0  ;;  %v1351_v22 = vpop.f32.mrf.mxu1 }
 0x142   : > { %1382 = vmatprep.subr.bf16.mxu0 %v1763_v0  ;;  %1375 = vmatpush3.bf16.msra.mxu1 %v1509_v54 }
 0x143   : > { %v735_v41 = vpop.f32.mrf.mxu0  ;;  %1376 = vmatprep.subr.bf16.mxu1 %v1763_v0 }
 0x144   : > { %v736_v1 = vadd.f32 %v1292_v60, %v735_v41 }
 0x145   : > { %v1358_v43 = vpop.f32.mrf.mxu0 }
 0x146   : > { %1377 = vmatpush3.bf16.msra.mxu1 %v1510_v55  ;;  %v741_v5 = vpack.c.bf16 %v736_v1, %v736_v1  ;;  %v1512_v43 = vld [vmem:[%s2118_s11] sm:$0xff]  }
 0x147   : > { %v738_v45 = vpop.f32.mrf.mxu0  ;;  %1388 = vmatprep.subr.bf16.mxu1 %v1763_v0 }
 0x148   : > { %v902_v8 = vunpack.c.l.bf16 %v741_v5 }
 0x149   : > { %v1359_v47 = vpop.f32.mrf.mxu0 }
 0x14a   : > { %v1288_v47 = vld [vmem:[#allocation7] ss:$0 sm:$0xff] }
 0x200   : > { %v803_v24 = vpop.f32.mrf.mxu1 }
 0x201   : > { %v804_v25 = vadd.f32 %v1296_v23, %v803_v24 }
 0x202   : > { %v1366_v26 = vpop.f32.mrf.mxu1 }
 0x203   : > { %v810_v27 = vsel %vm809_vm3, %v804_v25, -inf }
 0x204   : > { %v811_v28 = vrot.slane %v810_v27, 4  ;;  %v806_v29 = vpop.f32.mrf.mxu1 }
 0x206   : > { %v812_v30 = vmax.f32 %v810_v27, %v811_v28  ;;  %v1367_v31 = vpop.f32.mrf.mxu1 }
 0x208   : > { %v813_v32 = vrot.slane %v812_v30, 2 }
 0x20a   : > { %v814_v33 = vmax.f32 %v812_v30, %v813_v32 }
 0x20c   : > { %v815_v34 = vrot.slane %v814_v33, 1 }
 0x20e   : > { %v816_v35 = vmax.f32 %v814_v33, %v815_v34 }
 0x210   : > { %v817_v36 = vsub.f32 %v804_v25, %v816_v35 }
 0x212   : > { %v818_v37 = vmul.f32 1.442695, %v817_v36 }
 0x214   : > { %1513 = vpow2.f32 %v818_v37 }
 0x221   : > { %v1514_v38 = vpop.eup %1513 }
 0x222   : > { %v820_v39 = vsel %vm809_vm3, %v1514_v38, 0.0 }
 0x223   : > { %v821_v40 = vrot.slane %v820_v39, 4 }
 0x225   : > { %v822_v42 = vadd.f32 %v821_v40, %v820_v39 }
 0x227   : > { %v823_v44 = vrot.slane %v822_v42, 2 }
 0x229   : > { %v824_v46 = vadd.f32 %v823_v44, %v822_v42  ;;  %v1511_v42 = vld [vmem:[%s2118_s11 + $0x8] sm:$0xff]  }
 0x22b   : > { %v825_v48 = vrot.slane %v824_v46, 1 }
 0x22d   : > { %v826_v49 = vadd.f32 %v825_v48, %v824_v46 }
 0x22f   : > { %1515 = vrcp.f32 %v826_v49 }
 0x23c   : > { %v1516_v50 = vpop.eup %1515 }
 0x23d   : > { %v828_v51 = vmul.f32 %v1516_v50, %v1514_v38 }
 0x23f   : > { %v829_v52 = vpack.c.bf16 %v828_v51, %v828_v51  ;;  %v672_v51 = vadd.f32 %v1288_v47, %v2010_v16  ;;  %v1309_v16 = vld [vmem:[%s2119_s12] ss:$0 sm:$0xff] }
 0x241   : > { %830 = vxpose.xlu0.c.b16.start.end [1/1] (short) (narrow) %v829_v52, 16  ;;  %v677_v54 = vpack.c.bf16 %v672_v51, %v672_v51 }
 0x2a3   : > { %v838_v53 = vpop.trf.xlu0 }
 0x2a4   : > { %1371 = vmatmul.mubr.msk.bf16.vlgmr.msra.gmra.mxu0 %vm846_vm4, %v838_v53 }
 0x2a5   : > { %1384 = vmatprep.mubr.msk.bf16.mxu0 %vm1764_vm0, %v1763_v0 }
 0x364   : > { %v887_v57 = vpop.f32.mrf.mxu0 }
 0x365   : > { %v893_v58 = vmul.f32 %v887_v57, %v742_v56 }
 0x366   : > { %v1372_v59 = vpop.f32.mrf.mxu0 }
 0x367   : > { %v895_v61 = vsel %vm894_vm5, %v893_v58, 0.0  ;;  %v1060_v58 = vunpack.c.l.bf16 %v677_v54 }
 0x368   : > { %v896_v62 = vrot.slane %v895_v61, 4  ;;  %v890_v63 = vpop.f32.mrf.mxu0 }
 0x36a   : > { %v897_v2 = vadd.f32 %v896_v62, %v895_v61  ;;  %v1373_v3 = vpop.f32.mrf.mxu0  ;;  %v1063_v61 = vunpack.c.l.bf16 %v2008_v15 }
 0x36c   : > { %v898_v4 = vrot.slane %v897_v2, 2 }
 0x36e   : > { %v899_v6 = vadd.f32 %v898_v4, %v897_v2 }
 0x370   : > { %v900_v7 = vrot.slane %v899_v6, 1 }
 0x372   : > { %v901_v9 = vadd.f32 %v900_v7, %v899_v6 }
 0x374   : > { %v903_v10 = vmul.f32 %v902_v8, %v901_v9 }
 0x376   : > { %v904_v11 = vpack.c.bf16 %v903_v10, %v903_v10 }
 0x378   : > { %1379 = vmatmul.mubr.msk.bf16.vlgmr.msra.gmra.mxu1 %vm569_vm1, %v904_v11  ;;  %v1010_v12 = vsel %vm850_vm2, %v904_v11, 0 }
 0x379   : > { %1383 = vmatpush3.bf16.msra.mxu0 %v1010_v12  ;;  %1392 = vmatprep.mubr.msk.bf16.mxu1 %vm1764_vm0, %v1763_v0 }
 0x37a   : > { %1389 = vmatpush3.bf16.msra.mxu1 %v1511_v42 }
 0x37b   : > { %1390 = vmatprep.subr.bf16.mxu1 %v1763_v0 }
 0x37e   : > { %1391 = vmatpush3.bf16.msra.mxu1 %v1512_v43 }
 0x438   : > { %v965_v14 = vpop.f32.mrf.mxu1 }
 0x439   : > { %v966_v17 = vadd.f32 %v1301_v13, %v965_v14 }
 0x43a   : > { %v1380_v18 = vpop.f32.mrf.mxu1 }
 0x43b   : > { %v971_v19 = vsel %vm809_vm3, %v966_v17, -inf }
 0x43c   : > { %v972_v20 = vrot.slane %v971_v19, 4  ;;  %v968_v21 = vpop.f32.mrf.mxu1 }
 0x43e   : > { %v973_v22 = vmax.f32 %v971_v19, %v972_v20  ;;  %v1381_v23 = vpop.f32.mrf.mxu1 }
 0x440   : > { %v974_v24 = vrot.slane %v973_v22, 2 }
 0x442   : > { %v975_v25 = vmax.f32 %v973_v22, %v974_v24 }
 0x444   : > { %v976_v26 = vrot.slane %v975_v25, 1 }
 0x446   : > { %v977_v27 = vmax.f32 %v975_v25, %v976_v26 }
 0x448   : > { %v978_v28 = vsub.f32 %v966_v17, %v977_v27 }
 0x44a   : > { %v979_v29 = vmul.f32 1.442695, %v978_v28 }
 0x44c   : > { %1517 = vpow2.f32 %v979_v29 }
 0x459   : > { %v1518_v30 = vpop.eup %1517 }
 0x45a   : > { %v981_v31 = vsel %vm809_vm3, %v1518_v30, 0.0 }
 0x45b   : > { %v982_v32 = vrot.slane %v981_v31, 4 }
 0x45d   : > { %v983_v33 = vadd.f32 %v982_v32, %v981_v31 }
 0x45f   : > { %v984_v34 = vrot.slane %v983_v33, 2 }
 0x461   : > { %v985_v35 = vadd.f32 %v984_v34, %v983_v33 }
 0x463   : > { %v986_v36 = vrot.slane %v985_v35, 1 }
 0x465   : > { %v987_v37 = vadd.f32 %v986_v36, %v985_v35 }
 0x467   : > { %1519 = vrcp.f32 %v987_v37 }
 0x474   : > { %v1520_v38 = vpop.eup %1519 }
 0x475   : > { %v989_v39 = vmul.f32 %v1520_v38, %v1518_v30 }
 0x477   : > { %v990_v40 = vpack.c.bf16 %v989_v39, %v989_v39 }
 0x479   : > { %991 = vxpose.xlu0.c.b16.start.end [1/1] (short) (narrow) %v990_v40, 16 }
 0x4db   : > { %v999_v41 = vpop.trf.xlu0 }
 0x4dc   : > { %1385 = vmatmul.mubr.msk.bf16.vlgmr.msra.gmra.mxu0 %vm846_vm4, %v999_v41 }
 0x59c   : > { %v1046_v44 = vpop.f32.mrf.mxu0 }
 0x59d   : > { %v1052_v45 = vmul.f32 %v1046_v44, %v742_v56 }
 0x59e   : > { %v1386_v46 = vpop.f32.mrf.mxu0 }
 0x59f   : > { %v1053_v48 = vsel %vm894_vm5, %v1052_v45, 0.0 }
 0x5a0   : > { %v1054_v49 = vrot.slane %v1053_v48, 4  ;;  %v1049_v50 = vpop.f32.mrf.mxu0 }
 0x5a2   : > { %v1055_v52 = vadd.f32 %v1054_v49, %v1053_v48  ;;  %v1387_v53 = vpop.f32.mrf.mxu0 }
 0x5a4   : > { %v1056_v0 = vrot.slane %v1055_v52, 2 }
 0x5a6   : > { %v1057_v55 = vadd.f32 %v1056_v0, %v1055_v52 }
 0x5a8   : > { %v1058_v57 = vrot.slane %v1057_v55, 1 }
 0x5aa   : > { %v1059_v59 = vadd.f32 %v1058_v57, %v1057_v55 }
 0x5ac   : > { %v1061_v60 = vmul.f32 %v1060_v58, %v1059_v59 }
 0x5ae   : > { %v1062_v56 = vpack.c.bf16 %v1061_v60, %v1061_v60 }
 0x5b0   : > { %1393 = vmatmul.mubr.msk.bf16.vlgmr.msra.gmra.mxu1 %vm569_vm1, %v1062_v56 }
 0x670   : > { %v1117_v62 = vpop.f32.mrf.mxu1 }
 0x671   : > { %v1123_v63 = vadd.f32 %v1117_v62, %v1063_v61 }
 0x672   : > { %v1394_v1 = vpop.f32.mrf.mxu1 }
 0x673   : > { %v1131_v2 = vadd.f32 %v1309_v16, %v1123_v63 }
 0x674   : > { %v1120_v15 = vpop.f32.mrf.mxu1 }
 0x675   : > { %1132 = vst.msk [vmem:[%s538_s27] sm:$0xff] %vm569_vm1, %v1131_v2 }
 0x676   : > { %v1395_v3 = vpop.f32.mrf.mxu1 }
 0x677   : > { %1690 = shalt.err (!%p1687_p5)
}
 0x678   : > { %s1691_s25 = scalar_lea.hbm %s2065_s26, 128  ;;  %s1695_s21 = scalar_lea.hbm %s2121_s14, 256 }
 0x679   : > { %p1692_p0 = scmp.ne.s32.totalorder %s2065_s26, %s1691_s25  ;;  %p1696_p10 = scmp.lt.s32.totalorder %s2065_s26, %s2121_s14 }
 0x67a   : > { %p1697_p1 = scmp.lt.s32.totalorder %s1695_s21, %s1691_s25 }
 0x67b   : > { %p1693_p3 = pnand %p1692_p0, %p2149_p7 }
 0x67c   : > { %p1698_p2 = por %p1697_p1, %p1696_p10 }
 0x67d   : > { %p1694_p12 = pneg %p1693_p3 }
 0x67f   : > { %p1699_p4 = pnand %p1698_p2, %p1694_p12 }
 0x681   : > { %1702 = shalt.err (!%p1699_p4)
}
 0x682   : > { %1420 = dma.vmem_to_hbm [thread:$0]  (%p2149_p7), %s2067_s16, 128, %s2065_s26, %s1134_s17  }
 0x683 PF: > { %s2150_s20 = sld [smem:[#allocation21_spill]] }
 0x684   : > { %s2151_s19 = sld [smem:[#allocation19_spill]] }
 0x685   : > { %s2152_s24 = sld [smem:[#allocation24_spill]] }
 0x689   : > { %p1457_p9 = scmp.ge.s32.totalorder %s2150_s20, 2 }
 0x68a   : > { %s1159_s22 = sand.u32 1, %s2151_s19  }
 0x68b   : > { %p2153_p8 = scmp.ne.s32.totalorder %s2152_s24, 0  ;;  %s1160_s15 = scalar_lea.sflag [#allocation4], %s1159_s22 }
 0x68d   : > { %p1442_p11 = pnand %p1457_p9, %p2153_p8 }
 0x68f   : > { %p1443_p6 = pneg %p1442_p11 }
 0x691   : > { %1736 = dma.done.wait (%p1443_p6), %s1160_s15, 128  }
 0x692   : > { %1738 = vsyncadd (%p1443_p6), %s1160_s15, 4294967168  ;;  %s2154_s16 = sld [smem:[#allocation22_spill]]  ;;  %s2157_s29 = smov %s1745_s30 }
 0x693   : > { %s2155_s25 = sld [smem:[#allocation20_spill]] }
 0x694   : > { %s2156_s15 = sld [smem:[#allocation23_spill]] }
 0x698   : > { %p28_p13 = scmp.ge.s32.totalorder %s2154_s16, 4  }
 0x699   : > { %s2158_s30 = smov %s2155_s25 }
 0x69a   :  { %30 = sbr.rel (!%p28_p13) target bundleno = 7 (0x7), region = 136 }
 0x69f   :  { %1165 = vsyncpa [#allocation3], 1 }
 0x6a0   :  { %1167 = vsyncpa [#allocation3 + $0x1], 1 }
 0x6a1   :  { %1168 = vsyncpa [#allocation6], 1 }
 0x6a2   :  { %1169 = vsyncpa [#allocation9], 1 }
 0x6a3   :  { %1170 = vsyncpa [#allocation12], 1 }
 0x6a4   :  { %1171 = vsyncpa [#allocation4], 1 }
 0x6a5   :  { %1173 = vsyncpa [#allocation4 + $0x1], 1 }

</bundles_post_ra>
